<compile_context>
chip_gen: v7x
topology: tpu7x:2x2x1
jax: 0.10.0
libtpu: 0.0.40
codegen_flags: <defaults>
</compile_context>

<pallas_src>
import functools

import numpy as np
import jax
import jax.numpy as jnp
from jax.experimental import pallas as pl
from jax.experimental.pallas import tpu as pltpu

HIDDEN_DIM = 32
OUT_DIM = 8
NUM_LAYERS = 2
# reduction="max" (CLRS MPNN default), activation=ReLU, msgs_mlp_sizes=[H, H]

ATOM_FEATURE_DIMS = [119, 4, 12, 12, 10, 6, 6, 2, 2]   # ogb AtomEncoder vocab sizes
BOND_FEATURE_DIMS = [5, 6, 2]                           # ogb BondEncoder vocab sizes


# ------------------------------ Pallas kernel -------------------------------

def _fused_model_kernel(node_ref, eflat_ref, mg_ref,
                        wz_ref, bz_ref, we_ref, be_ref,
                        wl1_ref, bl1_ref, wl2_ref, bl2_ref,
                        wo2_ref, bo2_ref, wred_ref, bred_ref,
                        gpw1_ref, gpb1_ref, gpw2_ref, gpb2_ref,
                        out_ref, *, msgs_dtype):
    """All layers (both MPNN branches + reduce Linear) + graph head, for Bt graphs."""
    Bt, N, H = node_ref.shape
    NN = eflat_ref.shape[1]        # N * N (sender-major flatten)
    L = wz_ref.shape[0]            # num layers
    C2 = we_ref.shape[2]           # 2H  (columns ordered [random | pretrained])

    x = node_ref[...].reshape(Bt * N, H)           # f32 node features
    ef = eflat_ref[...].reshape(Bt * NN, H)        # bf16 edge features
    h = jnp.zeros((Bt * N, H), jnp.float32)        # hidden = zeros, as in the torch forward

    for l in range(L):                             # static unroll over layers (L=2)
        # z = cat([node_fts, hidden]); ONE wide K=2H matmul gives m_1/m_2/o1 of BOTH branches.
        z = jnp.concatenate([x, h], axis=-1).astype(jnp.bfloat16)               # [Bt*N, 2H]
        zz = jnp.dot(z, wz_ref[l], preferred_element_type=jnp.float32) + bz_ref[l]  # [Bt*N, 6H]
        m1 = zz[:, 0:C2].reshape(Bt, N, C2)        # varies with receiver j
        m2 = zz[:, C2:2 * C2].reshape(Bt, N, C2)   # varies with sender i
        h1 = zz[:, 2 * C2:3 * C2]                  # o1(z), both branches

        # Edge messages for both branches (bf16 x bf16, f32 accumulation).
        me = jnp.dot(ef, we_ref[l], preferred_element_type=jnp.float32) + be_ref[l]  # [Bt*NN, 2H]
        mg = mg_ref[l]                             # [Bt, 1, 2H]  (hoisted m_g)

        # msgs[b, i, j] = m_1[b, j] + m_2[b, i] + m_e[b, i, j] + m_g[b]   (i = sender axis)
        msgs = (me.reshape(Bt, N, N, C2).astype(msgs_dtype)
                + m1[:, None, :, :].astype(msgs_dtype)
                + m2[:, :, None, :].astype(msgs_dtype)
                + mg[:, :, None, :].astype(msgs_dtype))
        msgs = jnp.maximum(msgs, 0.0)              # relu before the msgs MLP
        msgs = msgs.reshape(Bt * NN, C2).astype(jnp.bfloat16)

        # Two-layer message MLP for both branches via block-diagonal weights.
        msgs = jnp.maximum(
            jnp.dot(msgs, wl1_ref[l], preferred_element_type=jnp.float32) + bl1_ref[l], 0.0)
        msgs = (jnp.dot(msgs.astype(jnp.bfloat16), wl2_ref[l],
                        preferred_element_type=jnp.float32) + bl2_ref[l])        # [Bt*NN, 2H]

        # Max over senders.  adj_mat == 1 everywhere in the reference model, so no mask.
        red = jnp.max(msgs.reshape(Bt, N, N, C2), axis=1).reshape(Bt * N, C2)    # [Bt*N, 2H]

        h2 = (jnp.dot(red.astype(jnp.bfloat16), wo2_ref[l],
                      preferred_element_type=jnp.float32) + bo2_ref[l])
        hcat = jnp.maximum(h1 + h2, 0.0).astype(jnp.bfloat16)   # relu(cat[random, pretrained])

        # reduction_layer: Linear(2H, H)
        h = jnp.dot(hcat, wred_ref[l], preferred_element_type=jnp.float32) + bred_ref[l]

    # Graph head fused in: mean over all padded node slots (matches torch) -> MLP.
    emb = jnp.mean(h.reshape(Bt, N, H), axis=1)                 # [Bt, H]
    gz = jnp.maximum(
        jnp.dot(emb.astype(jnp.bfloat16), gpw1_ref[...],
                preferred_element_type=jnp.float32) + gpb1_ref[...], 0.0)
    res = (jnp.dot(gz.astype(jnp.bfloat16), gpw2_ref[...],
                   preferred_element_type=jnp.float32) + gpb2_ref[...])          # [Bt, OUT]
    out_ref[...] = res.reshape(Bt, 1, res.shape[-1])


# ------------------------------ wrapper --------------------------------------

def _const_spec(arr):
    nd = arr.ndim
    return pl.BlockSpec(arr.shape, lambda b, _nd=nd: (0,) * _nd)
    # TODO(synk): single-buffer these constant weight specs (pipeline_mode=pl.Buffered(1))
    # once exercised at larger H; negligible VMEM at H=32.


def _pick_msgs_dtype():
    """bf16 elementwise msgs phase only where the VPU has bf16 ALUs (v6e / v7x)."""
    try:
        dk = jax.devices()[0].device_kind.lower()
    except Exception:
        return jnp.float32
    if any(t in dk for t in ("v2", "v3", "v4", "v5")):
        return jnp.float32
    return jnp.bfloat16


def _vmem_bytes_estimate(bt, N, H, L):
    NN, C2 = N * N, 2 * H
    edge = 2 * bt * NN * H * 2                      # bf16 edge block, double buffered
    node = 2 * bt * N * H * 4
    mg = 2 * L * bt * C2 * 4
    inter = 4 * bt * NN * C2 * 4                    # msgs-phase intermediates (generous)
    weights = 2 * L * ((2 * H) * (6 * H) + H * C2 + 3 * C2 * C2 + C2 * H) * 2
    return edge + node + mg + inter + weights + (1 << 20)


def _choose_block_graphs(B, N, H, L, budget_bytes=20 << 20):
    """Largest bt dividing B that fits the VMEM budget, keeping >=2 grid steps (v7x 2 TCs)."""
    best = 1
    for bt in range(1, B + 1):
        if B % bt:
            continue
        if B >= 2 and (B // bt) < 2:
            continue
        if _vmem_bytes_estimate(bt, N, H, L) <= budget_bytes:
            best = bt
    return best


def run_parallel_mpnn(node_dense, edge_flat, mg_stack, stacked_weights, graph_head,
                      *, block_graphs=None, msgs_dtype=None):
    """Whole ParallelMPNN forward in one pallas_call, grid-parallel over graph blocks."""
    B, N, H = node_dense.shape
    NN = edge_flat.shape[1]
    L = mg_stack.shape[0]
    C2 = mg_stack.shape[-1]
    out_dim = graph_head[2].shape[1]

    if msgs_dtype is None:
        msgs_dtype = _pick_msgs_dtype()
    bt = block_graphs if block_graphs is not None else _choose_block_graphs(B, N, H, L)
    assert B % bt == 0

    est = _vmem_bytes_estimate(bt, N, H, L)
    vmem_limit = int(min(max(2 * est, 32 << 20), 64 << 20))

    # TODO(synk): for very large N the (bt, N*N, H) edge block should be streamed over the
    # sender axis (manual DMA / inner grid dim with a VMEM max-accumulator) instead of held
    # whole in VMEM — matters first on v7x (64 MiB VMEM).
    weights = list(stacked_weights) + list(graph_head)
    data_specs = [
        pl.BlockSpec((bt, N, H), lambda b: (b, 0, 0)),         # node_fts
        pl.BlockSpec((bt, NN, H), lambda b: (b, 0, 0)),        # edge_fts (flattened, bf16)
        pl.BlockSpec((L, bt, 1, C2), lambda b: (0, b, 0, 0)),  # hoisted m_g, all layers
    ]
    out = pl.pallas_call(
        functools.partial(_fused_model_kernel, msgs_dtype=msgs_dtype),
        out_shape=jax.ShapeDtypeStruct((B, 1, out_dim), jnp.float32),
        grid=(B // bt,),
        in_specs=data_specs + [_const_spec(w) for w in weights],
        out_specs=pl.BlockSpec((bt, 1, out_dim), lambda b: (b, 0, 0)),
        compiler_params=pltpu.CompilerParams(
            dimension_semantics=("parallel",),
            vmem_limit_bytes=vmem_limit),
    )(node_dense, edge_flat, mg_stack, *weights)
    return out[:, 0, :]


# ------------------------------ parameter init & packing --------------------

def _init_linear(key, fan_in, fan_out):
    kw, kb = jax.random.split(key)
    bound = 1.0 / np.sqrt(fan_in)
    w = jax.random.uniform(kw, (fan_in, fan_out), jnp.float32, -bound, bound)
    b = jax.random.uniform(kb, (1, fan_out), jnp.float32, -bound, bound)
    return w, b


def _init_mpnn_params(key, h):
    keys = jax.random.split(key, 8)
    wm1, bm1 = _init_linear(keys[0], 2 * h, h)   # m_1 : Linear(2H, H)
    wm2, bm2 = _init_linear(keys[1], 2 * h, h)   # m_2 : Linear(2H, H)
    wme, bme = _init_linear(keys[2], h, h)       # m_e : Linear(H, H)
    wmg, bmg = _init_linear(keys[3], h, h)       # m_g : Linear(H, H)
    wl1, bl1 = _init_linear(keys[4], h, h)       # msgs MLP layer 1
    wl2, bl2 = _init_linear(keys[5], h, h)       # msgs MLP layer 2
    wo1, bo1 = _init_linear(keys[6], 2 * h, h)   # o1  : Linear(2H, H)
    wo2, bo2 = _init_linear(keys[7], h, h)       # o2  : Linear(H, H)
    return (wm1, bm1, wm2, bm2, wme, bme, wmg, bmg,
            wl1, bl1, wl2, bl2, wo1, bo1, wo2, bo2)


def _block_diag2(a, b):
    top = jnp.concatenate([a, jnp.zeros((a.shape[0], b.shape[1]), a.dtype)], axis=1)
    bot = jnp.concatenate([jnp.zeros((b.shape[0], a.shape[1]), b.dtype), b], axis=1)
    return jnp.concatenate([top, bot], axis=0)


def pack_layer_params(rand_p, pre_p, red_w, red_b, h):
    """Pack both branches' weights for wide / block-diagonal bf16 in-kernel matmuls."""
    (wm1_r, bm1_r, wm2_r, bm2_r, wme_r, bme_r, wmg_r, bmg_r,
     wl1_r, bl1_r, wl2_r, bl2_r, wo1_r, bo1_r, wo2_r, bo2_r) = rand_p
    (wm1_p, bm1_p, wm2_p, bm2_p, wme_p, bme_p, wmg_p, bmg_p,
     wl1_p, bl1_p, wl2_p, bl2_p, wo1_p, bo1_p, wo2_p, bo2_p) = pre_p

    cat = lambda a, b: jnp.concatenate([a, b], axis=1)
    bf = lambda a: a.astype(jnp.bfloat16)
    # Fused z-Linear: rows = K=2H (cat([node, hidden])); columns [0:2H]=m1_{r|p},
    # [2H:4H]=m2_{r|p}, [4H:6H]=o1_{r|p}  (random first, matching torch.cat order).
    wz = jnp.concatenate([wm1_r, wm1_p, wm2_r, wm2_p, wo1_r, wo1_p], axis=1)   # [2H, 6H]
    bz = jnp.concatenate([bm1_r, bm1_p, bm2_r, bm2_p, bo1_r, bo1_p], axis=1)   # [1, 6H]
    we, be = cat(wme_r, wme_p), cat(bme_r, bme_p)                              # [H, 2H]
    wl1, bl1 = _block_diag2(wl1_r, wl1_p), cat(bl1_r, bl1_p)                   # [2H, 2H]
    wl2, bl2 = _block_diag2(wl2_r, wl2_p), cat(bl2_r, bl2_p)
    wo2, bo2 = _block_diag2(wo2_r, wo2_p), cat(bo2_r, bo2_p)
    kernel_weights = (bf(wz), bz, bf(we), be, bf(wl1), bl1, bf(wl2), bl2,
                      bf(wo2), bo2, bf(red_w), red_b)
    graph_weights = (cat(wmg_r, wmg_p), cat(bmg_r, bmg_p))                     # hoisted m_g
    return kernel_weights, graph_weights


# ------------------------------ main -----------------------------------------

if __name__ == "__main__":
    key = jax.random.PRNGKey(0)
    H = HIDDEN_DIM

    # ---- synthetic graph batch (2 graphs: 8 + 5 nodes) ----
    nodes_per_graph = [8, 5]
    num_graphs = len(nodes_per_graph)
    num_nodes = sum(nodes_per_graph)
    batch_idx = np.repeat(np.arange(num_graphs), nodes_per_graph)

    edge_index = np.array(
        [[0, 1, 1, 2, 3, 4, 5, 6, 8, 9, 10, 11, 12],
         [1, 0, 2, 3, 4, 5, 6, 7, 9, 10, 11, 12, 8]], dtype=np.int32)
    num_edges = edge_index.shape[1]

    key, *ks = jax.random.split(key, 1 + len(ATOM_FEATURE_DIMS))
    x = jnp.stack([jax.random.randint(k, (num_nodes,), 0, d)
                   for k, d in zip(ks, ATOM_FEATURE_DIMS)], axis=1)
    key, *ks = jax.random.split(key, 1 + len(BOND_FEATURE_DIMS))
    edge_attr = jnp.stack([jax.random.randint(k, (num_edges,), 0, d)
                           for k, d in zip(ks, BOND_FEATURE_DIMS)], axis=1)

    # ---- Atom/Bond encoders (sum of per-feature embeddings); gather stays in JAX glue ----
    key, *ks = jax.random.split(key, 1 + len(ATOM_FEATURE_DIMS))
    atom_tables = [0.1 * jax.random.normal(k, (d, H), jnp.float32)
                   for k, d in zip(ks, ATOM_FEATURE_DIMS)]
    key, *ks = jax.random.split(key, 1 + len(BOND_FEATURE_DIMS))
    bond_tables = [0.1 * jax.random.normal(k, (d, H), jnp.float32)
                   for k, d in zip(ks, BOND_FEATURE_DIMS)]

    node_fts = sum(jnp.take(t, x[:, k], axis=0) for k, t in enumerate(atom_tables))
    edge_fts = sum(jnp.take(t, edge_attr[:, k], axis=0) for k, t in enumerate(bond_tables))

    # ---- to_dense_batch + dense edge features (mirrors the torch loop) ----
    max_nodes = max(nodes_per_graph)
    node_dense = jnp.zeros((num_graphs, max_nodes, H), jnp.float32)
    off = 0
    for g, n in enumerate(nodes_per_graph):
        node_dense = node_dense.at[g, :n].set(node_fts[off:off + n])
        off += n

    # Dense edge tensor built directly in bf16 (halves HBM traffic of the dominant tensor;
    # in-kernel matmuls still accumulate in f32).  Axis 1 = source/sender, axis 2 = target.
    edge_dense = jnp.zeros((num_graphs, max_nodes, max_nodes, H), jnp.bfloat16)
    src_graph = batch_idx[edge_index[0]]
    for g in range(num_graphs):
        m = src_graph == g
        local_ei = edge_index[:, m]
        local_ei = local_ei - local_ei.min()
        edge_dense = edge_dense.at[g, local_ei[0], local_ei[1]].set(
            edge_fts[np.where(m)[0]].astype(jnp.bfloat16))
    edge_flat = edge_dense.reshape(num_graphs, max_nodes * max_nodes, H)   # [B, N*N, H]

    graph_fts = jnp.zeros((num_graphs, 1, H), jnp.float32)   # zeros, as in forward
    # NOTE: adj_mat is torch.ones(...) in the reference forward, so the -1e6 max-mask is a
    # no-op and the adj input is dropped entirely.

    # ---- deterministic parameters ----
    # TODO(synk): the "pretrained" MPNN loads a .pt checkpoint in the original; here it is
    # just a second deterministic random init (same forward math).
    per_layer_weights, mg_list = [], []
    for i in range(NUM_LAYERS):
        key, k1, k2, k3 = jax.random.split(key, 4)
        red_w, red_b = _init_linear(k3, 2 * H, H)
        kweights, (wmg_cat, bmg_cat) = pack_layer_params(
            _init_mpnn_params(k1, H), _init_mpnn_params(k2, H), red_w, red_b, H)
        per_layer_weights.append(kweights)
        mg_list.append(jnp.matmul(graph_fts, wmg_cat) + bmg_cat)     # hoisted m_g: [B,1,2H]

    # Stack per-layer packed weights on a leading [L, ...] axis (kept VMEM-resident so the
    # edge tensor is streamed from HBM once for ALL layers, not once per layer).
    stacked_weights = tuple(
        jnp.stack([per_layer_weights[l][j] for l in range(NUM_LAYERS)], axis=0)
        for j in range(len(per_layer_weights[0])))
    mg_stack = jnp.stack(mg_list, axis=0)                            # [L, B, 1, 2H]

    key, k1, k2 = jax.random.split(key, 3)
    gp_w1, gp_b1 = _init_linear(k1, H, H)
    gp_w2, gp_b2 = _init_linear(k2, H, OUT_DIM)
    graph_head = (gp_w1.astype(jnp.bfloat16), gp_b1, gp_w2.astype(jnp.bfloat16), gp_b2)

    # ---- forward: ONE fused pallas_call (all layers + graph head) ----
    res = run_parallel_mpnn(node_dense, edge_flat, mg_stack, stacked_weights, graph_head)
    res = jax.block_until_ready(res)
    assert res.shape == (num_graphs, OUT_DIM) and res.dtype == jnp.float32
    print("KERNEL_OK")
</pallas_src>

<mosaic_0001>
module attributes {stable_mosaic.version = 11 : i64} {
  func.func @_fused_model_kernel(%arg0: i32, %arg1: memref<1x8x32xf32, #tpu.memory_space<vmem>>, %arg2: memref<1x64x32xbf16, #tpu.memory_space<vmem>>, %arg3: memref<2x1x1x64xf32, #tpu.memory_space<vmem>>, %arg4: memref<2x64x192xbf16, #tpu.memory_space<vmem>>, %arg5: memref<2x1x192xf32, #tpu.memory_space<vmem>>, %arg6: memref<2x32x64xbf16, #tpu.memory_space<vmem>>, %arg7: memref<2x1x64xf32, #tpu.memory_space<vmem>>, %arg8: memref<2x64x64xbf16, #tpu.memory_space<vmem>>, %arg9: memref<2x1x64xf32, #tpu.memory_space<vmem>>, %arg10: memref<2x64x64xbf16, #tpu.memory_space<vmem>>, %arg11: memref<2x1x64xf32, #tpu.memory_space<vmem>>, %arg12: memref<2x64x64xbf16, #tpu.memory_space<vmem>>, %arg13: memref<2x1x64xf32, #tpu.memory_space<vmem>>, %arg14: memref<2x64x32xbf16, #tpu.memory_space<vmem>>, %arg15: memref<2x1x32xf32, #tpu.memory_space<vmem>>, %arg16: memref<32x32xbf16, #tpu.memory_space<vmem>>, %arg17: memref<1x32xf32, #tpu.memory_space<vmem>>, %arg18: memref<32x8xbf16, #tpu.memory_space<vmem>>, %arg19: memref<1x8xf32, #tpu.memory_space<vmem>>, %arg20: memref<1x1x8xf32, #tpu.memory_space<vmem>>) attributes {dimension_semantics = [#tpu.dimension_semantics<parallel>], iteration_bounds = array<i64: 2>, scalar_prefetch = 0 : i64, scratch_operands = 0 : i64, tpu.core_type = #tpu.core_type<tc>, window_params = [{transform_indices = @transform_0, window_bounds = array<i64: 1, 8, 32>}, {transform_indices = @transform_1, window_bounds = array<i64: 1, 64, 32>}, {transform_indices = @transform_2, window_bounds = array<i64: 2, 1, 1, 64>}, {pipeline_mode = #tpu.pipeline_mode<synchronous>, transform_indices = @transform_3, window_bounds = array<i64: 2, 64, 192>}, {pipeline_mode = #tpu.pipeline_mode<synchronous>, transform_indices = @transform_4, window_bounds = array<i64: 2, 1, 192>}, {pipeline_mode = #tpu.pipeline_mode<synchronous>, transform_indices = @transform_5, window_bounds = array<i64: 2, 32, 64>}, {pipeline_mode = #tpu.pipeline_mode<synchronous>, transform_indices = @transform_6, window_bounds = array<i64: 2, 1, 64>}, {pipeline_mode = #tpu.pipeline_mode<synchronous>, transform_indices = @transform_7, window_bounds = array<i64: 2, 64, 64>}, {pipeline_mode = #tpu.pipeline_mode<synchronous>, transform_indices = @transform_8, window_bounds = array<i64: 2, 1, 64>}, {pipeline_mode = #tpu.pipeline_mode<synchronous>, transform_indices = @transform_9, window_bounds = array<i64: 2, 64, 64>}, {pipeline_mode = #tpu.pipeline_mode<synchronous>, transform_indices = @transform_10, window_bounds = array<i64: 2, 1, 64>}, {pipeline_mode = #tpu.pipeline_mode<synchronous>, transform_indices = @transform_11, window_bounds = array<i64: 2, 64, 64>}, {pipeline_mode = #tpu.pipeline_mode<synchronous>, transform_indices = @transform_12, window_bounds = array<i64: 2, 1, 64>}, {pipeline_mode = #tpu.pipeline_mode<synchronous>, transform_indices = @transform_13, window_bounds = array<i64: 2, 64, 32>}, {pipeline_mode = #tpu.pipeline_mode<synchronous>, transform_indices = @transform_14, window_bounds = array<i64: 2, 1, 32>}, {pipeline_mode = #tpu.pipeline_mode<synchronous>, transform_indices = @transform_15, window_bounds = array<i64: 32, 32>}, {pipeline_mode = #tpu.pipeline_mode<synchronous>, transform_indices = @transform_16, window_bounds = array<i64: 1, 32>}, {pipeline_mode = #tpu.pipeline_mode<synchronous>, transform_indices = @transform_17, window_bounds = array<i64: 32, 8>}, {pipeline_mode = #tpu.pipeline_mode<synchronous>, transform_indices = @transform_18, window_bounds = array<i64: 1, 8>}, {transform_indices = @transform_19, window_bounds = array<i64: 1, 1, 8>}]} {
    %c0 = arith.constant 0 : index
    %c0_0 = arith.constant 0 : index
    %c0_1 = arith.constant 0 : index
    %0 = vector.load %arg1[%c0, %c0_0, %c0_1] : memref<1x8x32xf32, #tpu.memory_space<vmem>>, vector<1x8x32xf32>
    %1 = vector.shape_cast %0 : vector<1x8x32xf32> to vector<8x32xf32>
    %c0_2 = arith.constant 0 : index
    %c0_3 = arith.constant 0 : index
    %c0_4 = arith.constant 0 : index
    %2 = vector.load %arg2[%c0_2, %c0_3, %c0_4] : memref<1x64x32xbf16, #tpu.memory_space<vmem>>, vector<1x64x32xbf16>
    %3 = vector.shape_cast %2 : vector<1x64x32xbf16> to vector<64x32xbf16>
    %cst = arith.constant 0.000000e+00 : f32
    %4 = vector.broadcast %cst : f32 to vector<8x32xf32>
    %5 = tpu.concatenate %1, %4 in 1 : vector<8x32xf32>, vector<8x32xf32> -> vector<8x64xf32>
    %6 = arith.truncf %5 : vector<8x64xf32> to vector<8x64xbf16>
    %c0_5 = arith.constant 0 : index
    %c0_6 = arith.constant 0 : index
    %c0_7 = arith.constant 0 : index
    %7 = vector.load %arg4[%c0_5, %c0_6, %c0_7] : memref<2x64x192xbf16, #tpu.memory_space<vmem>>, vector<1x64x192xbf16>
    %8 = vector.shape_cast %7 : vector<1x64x192xbf16> to vector<64x192xbf16>
    %cst_8 = arith.constant dense<0.000000e+00> : vector<8x192xf32>
    %9 = tpu.matmul %6, %8, %cst_8 {dimension_numbers = #tpu.dot_dimension_numbers<[1], [0], [0], [1], [0, 0, 1, 1], [], []>} : vector<8x64xbf16>, vector<64x192xbf16>, vector<8x192xf32> -> vector<8x192xf32>
    %c0_9 = arith.constant 0 : index
    %c0_10 = arith.constant 0 : index
    %c0_11 = arith.constant 0 : index
    %10 = vector.load %arg5[%c0_9, %c0_10, %c0_11] : memref<2x1x192xf32, #tpu.memory_space<vmem>>, vector<1x1x192xf32>
    %11 = vector.shape_cast %10 : vector<1x1x192xf32> to vector<1x192xf32>
    %12 = vector.broadcast %11 : vector<1x192xf32> to vector<8x192xf32>
    %13 = arith.addf %9, %12 : vector<8x192xf32>
    %14 = vector.extract_strided_slice %13 {offsets = [0, 0], sizes = [8, 64], strides = [1, 1]} : vector<8x192xf32> to vector<8x64xf32>
    %15 = vector.shape_cast %14 : vector<8x64xf32> to vector<1x8x64xf32>
    %16 = vector.extract_strided_slice %13 {offsets = [0, 64], sizes = [8, 64], strides = [1, 1]} : vector<8x192xf32> to vector<8x64xf32>
    %17 = vector.shape_cast %16 : vector<8x64xf32> to vector<1x8x64xf32>
    %18 = vector.extract_strided_slice %13 {offsets = [0, 128], sizes = [8, 64], strides = [1, 1]} : vector<8x192xf32> to vector<8x64xf32>
    %c0_12 = arith.constant 0 : index
    %c0_13 = arith.constant 0 : index
    %c0_14 = arith.constant 0 : index
    %19 = vector.load %arg6[%c0_12, %c0_13, %c0_14] : memref<2x32x64xbf16, #tpu.memory_space<vmem>>, vector<1x32x64xbf16>
    %20 = vector.shape_cast %19 : vector<1x32x64xbf16> to vector<32x64xbf16>
    %cst_15 = arith.constant dense<0.000000e+00> : vector<64x64xf32>
    %21 = tpu.matmul %3, %20, %cst_15 {dimension_numbers = #tpu.dot_dimension_numbers<[1], [0], [0], [1], [0, 0, 1, 1], [], []>} : vector<64x32xbf16>, vector<32x64xbf16>, vector<64x64xf32> -> vector<64x64xf32>
    %c0_16 = arith.constant 0 : index
    %c0_17 = arith.constant 0 : index
    %c0_18 = arith.constant 0 : index
    %22 = vector.load %arg7[%c0_16, %c0_17, %c0_18] : memref<2x1x64xf32, #tpu.memory_space<vmem>>, vector<1x1x64xf32>
    %23 = vector.shape_cast %22 : vector<1x1x64xf32> to vector<1x64xf32>
    %24 = vector.broadcast %23 : vector<1x64xf32> to vector<64x64xf32>
    %25 = arith.addf %21, %24 : vector<64x64xf32>
    %c0_19 = arith.constant 0 : index
    %c0_20 = arith.constant 0 : index
    %c0_21 = arith.constant 0 : index
    %c0_22 = arith.constant 0 : index
    %26 = vector.load %arg3[%c0_19, %c0_20, %c0_21, %c0_22] : memref<2x1x1x64xf32, #tpu.memory_space<vmem>>, vector<1x1x1x64xf32>
    %27 = vector.shape_cast %26 : vector<1x1x1x64xf32> to vector<1x1x64xf32>
    %28 = vector.shape_cast %25 : vector<64x64xf32> to vector<1x8x8x64xf32>
    %29 = arith.truncf %28 : vector<1x8x8x64xf32> to vector<1x8x8x64xbf16>
    %30 = vector.shape_cast %15 : vector<1x8x64xf32> to vector<1x1x8x64xf32>
    %31 = arith.truncf %30 : vector<1x1x8x64xf32> to vector<1x1x8x64xbf16>
    %32 = vector.broadcast %31 : vector<1x1x8x64xbf16> to vector<1x8x8x64xbf16>
    %33 = arith.addf %29, %32 : vector<1x8x8x64xbf16>
    %34 = vector.shape_cast %17 : vector<1x8x64xf32> to vector<1x8x1x64xf32>
    %35 = arith.truncf %34 : vector<1x8x1x64xf32> to vector<1x8x1x64xbf16>
    %36 = vector.broadcast %35 : vector<1x8x1x64xbf16> to vector<1x8x8x64xbf16>
    %37 = arith.addf %33, %36 : vector<1x8x8x64xbf16>
    %38 = vector.shape_cast %27 : vector<1x1x64xf32> to vector<1x1x1x64xf32>
    %39 = arith.truncf %38 : vector<1x1x1x64xf32> to vector<1x1x1x64xbf16>
    %40 = vector.broadcast %39 : vector<1x1x1x64xbf16> to vector<1x8x8x64xbf16>
    %41 = arith.addf %37, %40 : vector<1x8x8x64xbf16>
    %cst_23 = arith.constant 0.000000e+00 : bf16
    %42 = vector.broadcast %cst_23 : bf16 to vector<1x8x8x64xbf16>
    %43 = arith.maximumf %41, %42 : vector<1x8x8x64xbf16>
    %44 = vector.shape_cast %43 : vector<1x8x8x64xbf16> to vector<64x64xbf16>
    %c0_24 = arith.constant 0 : index
    %c0_25 = arith.constant 0 : index
    %c0_26 = arith.constant 0 : index
    %45 = vector.load %arg8[%c0_24, %c0_25, %c0_26] : memref<2x64x64xbf16, #tpu.memory_space<vmem>>, vector<1x64x64xbf16>
    %46 = vector.shape_cast %45 : vector<1x64x64xbf16> to vector<64x64xbf16>
    %cst_27 = arith.constant dense<0.000000e+00> : vector<64x64xf32>
    %47 = tpu.matmul %44, %46, %cst_27 {dimension_numbers = #tpu.dot_dimension_numbers<[1], [0], [0], [1], [0, 0, 1, 1], [], []>} : vector<64x64xbf16>, vector<64x64xbf16>, vector<64x64xf32> -> vector<64x64xf32>
    %c0_28 = arith.constant 0 : index
    %c0_29 = arith.constant 0 : index
    %c0_30 = arith.constant 0 : index
    %48 = vector.load %arg9[%c0_28, %c0_29, %c0_30] : memref<2x1x64xf32, #tpu.memory_space<vmem>>, vector<1x1x64xf32>
    %49 = vector.shape_cast %48 : vector<1x1x64xf32> to vector<1x64xf32>
    %50 = vector.broadcast %49 : vector<1x64xf32> to vector<64x64xf32>
    %51 = arith.addf %47, %50 : vector<64x64xf32>
    %cst_31 = arith.constant 0.000000e+00 : f32
    %52 = vector.broadcast %cst_31 : f32 to vector<64x64xf32>
    %53 = arith.maximumf %51, %52 : vector<64x64xf32>
    %54 = arith.truncf %53 : vector<64x64xf32> to vector<64x64xbf16>
    %c0_32 = arith.constant 0 : index
    %c0_33 = arith.constant 0 : index
    %c0_34 = arith.constant 0 : index
    %55 = vector.load %arg10[%c0_32, %c0_33, %c0_34] : memref<2x64x64xbf16, #tpu.memory_space<vmem>>, vector<1x64x64xbf16>
    %56 = vector.shape_cast %55 : vector<1x64x64xbf16> to vector<64x64xbf16>
    %cst_35 = arith.constant dense<0.000000e+00> : vector<64x64xf32>
    %57 = tpu.matmul %54, %56, %cst_35 {dimension_numbers = #tpu.dot_dimension_numbers<[1], [0], [0], [1], [0, 0, 1, 1], [], []>} : vector<64x64xbf16>, vector<64x64xbf16>, vector<64x64xf32> -> vector<64x64xf32>
    %c0_36 = arith.constant 0 : index
    %c0_37 = arith.constant 0 : index
    %c0_38 = arith.constant 0 : index
    %58 = vector.load %arg11[%c0_36, %c0_37, %c0_38] : memref<2x1x64xf32, #tpu.memory_space<vmem>>, vector<1x1x64xf32>
    %59 = vector.shape_cast %58 : vector<1x1x64xf32> to vector<1x64xf32>
    %60 = vector.broadcast %59 : vector<1x64xf32> to vector<64x64xf32>
    %61 = arith.addf %57, %60 : vector<64x64xf32>
    %62 = vector.shape_cast %61 : vector<64x64xf32> to vector<1x8x8x64xf32>
    %cst_39 = arith.constant dense<0xFF800000> : vector<1x8x64xf32>
    %63 = vector.multi_reduction <maximumf>, %62, %cst_39 [1] : vector<1x8x8x64xf32> to vector<1x8x64xf32>
    %64 = vector.shape_cast %63 : vector<1x8x64xf32> to vector<8x64xf32>
    %65 = arith.truncf %64 : vector<8x64xf32> to vector<8x64xbf16>
    %c0_40 = arith.constant 0 : index
    %c0_41 = arith.constant 0 : index
    %c0_42 = arith.constant 0 : index
    %66 = vector.load %arg12[%c0_40, %c0_41, %c0_42] : memref<2x64x64xbf16, #tpu.memory_space<vmem>>, vector<1x64x64xbf16>
    %67 = vector.shape_cast %66 : vector<1x64x64xbf16> to vector<64x64xbf16>
    %cst_43 = arith.constant dense<0.000000e+00> : vector<8x64xf32>
    %68 = tpu.matmul %65, %67, %cst_43 {dimension_numbers = #tpu.dot_dimension_numbers<[1], [0], [0], [1], [0, 0, 1, 1], [], []>} : vector<8x64xbf16>, vector<64x64xbf16>, vector<8x64xf32> -> vector<8x64xf32>
    %c0_44 = arith.constant 0 : index
    %c0_45 = arith.constant 0 : index
    %c0_46 = arith.constant 0 : index
    %69 = vector.load %arg13[%c0_44, %c0_45, %c0_46] : memref<2x1x64xf32, #tpu.memory_space<vmem>>, vector<1x1x64xf32>
    %70 = vector.shape_cast %69 : vector<1x1x64xf32> to vector<1x64xf32>
    %71 = vector.broadcast %70 : vector<1x64xf32> to vector<8x64xf32>
    %72 = arith.addf %68, %71 : vector<8x64xf32>
    %73 = arith.addf %18, %72 : vector<8x64xf32>
    %cst_47 = arith.constant 0.000000e+00 : f32
    %74 = vector.broadcast %cst_47 : f32 to vector<8x64xf32>
    %75 = arith.maximumf %73, %74 : vector<8x64xf32>
    %76 = arith.truncf %75 : vector<8x64xf32> to vector<8x64xbf16>
    %c0_48 = arith.constant 0 : index
    %c0_49 = arith.constant 0 : index
    %c0_50 = arith.constant 0 : index
    %77 = vector.load %arg14[%c0_48, %c0_49, %c0_50] : memref<2x64x32xbf16, #tpu.memory_space<vmem>>, vector<1x64x32xbf16>
    %78 = vector.shape_cast %77 : vector<1x64x32xbf16> to vector<64x32xbf16>
    %cst_51 = arith.constant dense<0.000000e+00> : vector<8x32xf32>
    %79 = tpu.matmul %76, %78, %cst_51 {dimension_numbers = #tpu.dot_dimension_numbers<[1], [0], [0], [1], [0, 0, 1, 1], [], []>} : vector<8x64xbf16>, vector<64x32xbf16>, vector<8x32xf32> -> vector<8x32xf32>
    %c0_52 = arith.constant 0 : index
    %c0_53 = arith.constant 0 : index
    %c0_54 = arith.constant 0 : index
    %80 = vector.load %arg15[%c0_52, %c0_53, %c0_54] : memref<2x1x32xf32, #tpu.memory_space<vmem>>, vector<1x1x32xf32>
    %81 = vector.shape_cast %80 : vector<1x1x32xf32> to vector<1x32xf32>
    %82 = vector.broadcast %81 : vector<1x32xf32> to vector<8x32xf32>
    %83 = arith.addf %79, %82 : vector<8x32xf32>
    %84 = tpu.concatenate %1, %83 in 1 : vector<8x32xf32>, vector<8x32xf32> -> vector<8x64xf32>
    %85 = arith.truncf %84 : vector<8x64xf32> to vector<8x64xbf16>
    %c1 = arith.constant 1 : index
    %c0_55 = arith.constant 0 : index
    %c0_56 = arith.constant 0 : index
    %86 = vector.load %arg4[%c1, %c0_55, %c0_56] : memref<2x64x192xbf16, #tpu.memory_space<vmem>>, vector<1x64x192xbf16>
    %87 = vector.shape_cast %86 : vector<1x64x192xbf16> to vector<64x192xbf16>
    %cst_57 = arith.constant dense<0.000000e+00> : vector<8x192xf32>
    %88 = tpu.matmul %85, %87, %cst_57 {dimension_numbers = #tpu.dot_dimension_numbers<[1], [0], [0], [1], [0, 0, 1, 1], [], []>} : vector<8x64xbf16>, vector<64x192xbf16>, vector<8x192xf32> -> vector<8x192xf32>
    %c1_58 = arith.constant 1 : index
    %c0_59 = arith.constant 0 : index
    %c0_60 = arith.constant 0 : index
    %89 = vector.load %arg5[%c1_58, %c0_59, %c0_60] : memref<2x1x192xf32, #tpu.memory_space<vmem>>, vector<1x1x192xf32>
    %90 = vector.shape_cast %89 : vector<1x1x192xf32> to vector<1x192xf32>
    %91 = vector.broadcast %90 : vector<1x192xf32> to vector<8x192xf32>
    %92 = arith.addf %88, %91 : vector<8x192xf32>
    %93 = vector.extract_strided_slice %92 {offsets = [0, 0], sizes = [8, 64], strides = [1, 1]} : vector<8x192xf32> to vector<8x64xf32>
    %94 = vector.shape_cast %93 : vector<8x64xf32> to vector<1x8x64xf32>
    %95 = vector.extract_strided_slice %92 {offsets = [0, 64], sizes = [8, 64], strides = [1, 1]} : vector<8x192xf32> to vector<8x64xf32>
    %96 = vector.shape_cast %95 : vector<8x64xf32> to vector<1x8x64xf32>
    %97 = vector.extract_strided_slice %92 {offsets = [0, 128], sizes = [8, 64], strides = [1, 1]} : vector<8x192xf32> to vector<8x64xf32>
    %c1_61 = arith.constant 1 : index
    %c0_62 = arith.constant 0 : index
    %c0_63 = arith.constant 0 : index
    %98 = vector.load %arg6[%c1_61, %c0_62, %c0_63] : memref<2x32x64xbf16, #tpu.memory_space<vmem>>, vector<1x32x64xbf16>
    %99 = vector.shape_cast %98 : vector<1x32x64xbf16> to vector<32x64xbf16>
    %cst_64 = arith.constant dense<0.000000e+00> : vector<64x64xf32>
    %100 = tpu.matmul %3, %99, %cst_64 {dimension_numbers = #tpu.dot_dimension_numbers<[1], [0], [0], [1], [0, 0, 1, 1], [], []>} : vector<64x32xbf16>, vector<32x64xbf16>, vector<64x64xf32> -> vector<64x64xf32>
    %c1_65 = arith.constant 1 : index
    %c0_66 = arith.constant 0 : index
    %c0_67 = arith.constant 0 : index
    %101 = vector.load %arg7[%c1_65, %c0_66, %c0_67] : memref<2x1x64xf32, #tpu.memory_space<vmem>>, vector<1x1x64xf32>
    %102 = vector.shape_cast %101 : vector<1x1x64xf32> to vector<1x64xf32>
    %103 = vector.broadcast %102 : vector<1x64xf32> to vector<64x64xf32>
    %104 = arith.addf %100, %103 : vector<64x64xf32>
    %c1_68 = arith.constant 1 : index
    %c0_69 = arith.constant 0 : index
    %c0_70 = arith.constant 0 : index
    %c0_71 = arith.constant 0 : index
    %105 = vector.load %arg3[%c1_68, %c0_69, %c0_70, %c0_71] : memref<2x1x1x64xf32, #tpu.memory_space<vmem>>, vector<1x1x1x64xf32>
    %106 = vector.shape_cast %105 : vector<1x1x1x64xf32> to vector<1x1x64xf32>
    %107 = vector.shape_cast %104 : vector<64x64xf32> to vector<1x8x8x64xf32>
    %108 = arith.truncf %107 : vector<1x8x8x64xf32> to vector<1x8x8x64xbf16>
    %109 = vector.shape_cast %94 : vector<1x8x64xf32> to vector<1x1x8x64xf32>
    %110 = arith.truncf %109 : vector<1x1x8x64xf32> to vector<1x1x8x64xbf16>
    %111 = vector.broadcast %110 : vector<1x1x8x64xbf16> to vector<1x8x8x64xbf16>
    %112 = arith.addf %108, %111 : vector<1x8x8x64xbf16>
    %113 = vector.shape_cast %96 : vector<1x8x64xf32> to vector<1x8x1x64xf32>
    %114 = arith.truncf %113 : vector<1x8x1x64xf32> to vector<1x8x1x64xbf16>
    %115 = vector.broadcast %114 : vector<1x8x1x64xbf16> to vector<1x8x8x64xbf16>
    %116 = arith.addf %112, %115 : vector<1x8x8x64xbf16>
    %117 = vector.shape_cast %106 : vector<1x1x64xf32> to vector<1x1x1x64xf32>
    %118 = arith.truncf %117 : vector<1x1x1x64xf32> to vector<1x1x1x64xbf16>
    %119 = vector.broadcast %118 : vector<1x1x1x64xbf16> to vector<1x8x8x64xbf16>
    %120 = arith.addf %116, %119 : vector<1x8x8x64xbf16>
    %cst_72 = arith.constant 0.000000e+00 : bf16
    %121 = vector.broadcast %cst_72 : bf16 to vector<1x8x8x64xbf16>
    %122 = arith.maximumf %120, %121 : vector<1x8x8x64xbf16>
    %123 = vector.shape_cast %122 : vector<1x8x8x64xbf16> to vector<64x64xbf16>
    %c1_73 = arith.constant 1 : index
    %c0_74 = arith.constant 0 : index
    %c0_75 = arith.constant 0 : index
    %124 = vector.load %arg8[%c1_73, %c0_74, %c0_75] : memref<2x64x64xbf16, #tpu.memory_space<vmem>>, vector<1x64x64xbf16>
    %125 = vector.shape_cast %124 : vector<1x64x64xbf16> to vector<64x64xbf16>
    %cst_76 = arith.constant dense<0.000000e+00> : vector<64x64xf32>
    %126 = tpu.matmul %123, %125, %cst_76 {dimension_numbers = #tpu.dot_dimension_numbers<[1], [0], [0], [1], [0, 0, 1, 1], [], []>} : vector<64x64xbf16>, vector<64x64xbf16>, vector<64x64xf32> -> vector<64x64xf32>
    %c1_77 = arith.constant 1 : index
    %c0_78 = arith.constant 0 : index
    %c0_79 = arith.constant 0 : index
    %127 = vector.load %arg9[%c1_77, %c0_78, %c0_79] : memref<2x1x64xf32, #tpu.memory_space<vmem>>, vector<1x1x64xf32>
    %128 = vector.shape_cast %127 : vector<1x1x64xf32> to vector<1x64xf32>
    %129 = vector.broadcast %128 : vector<1x64xf32> to vector<64x64xf32>
    %130 = arith.addf %126, %129 : vector<64x64xf32>
    %cst_80 = arith.constant 0.000000e+00 : f32
    %131 = vector.broadcast %cst_80 : f32 to vector<64x64xf32>
    %132 = arith.maximumf %130, %131 : vector<64x64xf32>
    %133 = arith.truncf %132 : vector<64x64xf32> to vector<64x64xbf16>
    %c1_81 = arith.constant 1 : index
    %c0_82 = arith.constant 0 : index
    %c0_83 = arith.constant 0 : index
    %134 = vector.load %arg10[%c1_81, %c0_82, %c0_83] : memref<2x64x64xbf16, #tpu.memory_space<vmem>>, vector<1x64x64xbf16>
    %135 = vector.shape_cast %134 : vector<1x64x64xbf16> to vector<64x64xbf16>
    %cst_84 = arith.constant dense<0.000000e+00> : vector<64x64xf32>
    %136 = tpu.matmul %133, %135, %cst_84 {dimension_numbers = #tpu.dot_dimension_numbers<[1], [0], [0], [1], [0, 0, 1, 1], [], []>} : vector<64x64xbf16>, vector<64x64xbf16>, vector<64x64xf32> -> vector<64x64xf32>
    %c1_85 = arith.constant 1 : index
    %c0_86 = arith.constant 0 : index
    %c0_87 = arith.constant 0 : index
    %137 = vector.load %arg11[%c1_85, %c0_86, %c0_87] : memref<2x1x64xf32, #tpu.memory_space<vmem>>, vector<1x1x64xf32>
    %138 = vector.shape_cast %137 : vector<1x1x64xf32> to vector<1x64xf32>
    %139 = vector.broadcast %138 : vector<1x64xf32> to vector<64x64xf32>
    %140 = arith.addf %136, %139 : vector<64x64xf32>
    %141 = vector.shape_cast %140 : vector<64x64xf32> to vector<1x8x8x64xf32>
    %cst_88 = arith.constant dense<0xFF800000> : vector<1x8x64xf32>
    %142 = vector.multi_reduction <maximumf>, %141, %cst_88 [1] : vector<1x8x8x64xf32> to vector<1x8x64xf32>
    %143 = vector.shape_cast %142 : vector<1x8x64xf32> to vector<8x64xf32>
    %144 = arith.truncf %143 : vector<8x64xf32> to vector<8x64xbf16>
    %c1_89 = arith.constant 1 : index
    %c0_90 = arith.constant 0 : index
    %c0_91 = arith.constant 0 : index
    %145 = vector.load %arg12[%c1_89, %c0_90, %c0_91] : memref<2x64x64xbf16, #tpu.memory_space<vmem>>, vector<1x64x64xbf16>
    %146 = vector.shape_cast %145 : vector<1x64x64xbf16> to vector<64x64xbf16>
    %cst_92 = arith.constant dense<0.000000e+00> : vector<8x64xf32>
    %147 = tpu.matmul %144, %146, %cst_92 {dimension_numbers = #tpu.dot_dimension_numbers<[1], [0], [0], [1], [0, 0, 1, 1], [], []>} : vector<8x64xbf16>, vector<64x64xbf16>, vector<8x64xf32> -> vector<8x64xf32>
    %c1_93 = arith.constant 1 : index
    %c0_94 = arith.constant 0 : index
    %c0_95 = arith.constant 0 : index
    %148 = vector.load %arg13[%c1_93, %c0_94, %c0_95] : memref<2x1x64xf32, #tpu.memory_space<vmem>>, vector<1x1x64xf32>
    %149 = vector.shape_cast %148 : vector<1x1x64xf32> to vector<1x64xf32>
    %150 = vector.broadcast %149 : vector<1x64xf32> to vector<8x64xf32>
    %151 = arith.addf %147, %150 : vector<8x64xf32>
    %152 = arith.addf %97, %151 : vector<8x64xf32>
    %cst_96 = arith.constant 0.000000e+00 : f32
    %153 = vector.broadcast %cst_96 : f32 to vector<8x64xf32>
    %154 = arith.maximumf %152, %153 : vector<8x64xf32>
    %155 = arith.truncf %154 : vector<8x64xf32> to vector<8x64xbf16>
    %c1_97 = arith.constant 1 : index
    %c0_98 = arith.constant 0 : index
    %c0_99 = arith.constant 0 : index
    %156 = vector.load %arg14[%c1_97, %c0_98, %c0_99] : memref<2x64x32xbf16, #tpu.memory_space<vmem>>, vector<1x64x32xbf16>
    %157 = vector.shape_cast %156 : vector<1x64x32xbf16> to vector<64x32xbf16>
    %cst_100 = arith.constant dense<0.000000e+00> : vector<8x32xf32>
    %158 = tpu.matmul %155, %157, %cst_100 {dimension_numbers = #tpu.dot_dimension_numbers<[1], [0], [0], [1], [0, 0, 1, 1], [], []>} : vector<8x64xbf16>, vector<64x32xbf16>, vector<8x32xf32> -> vector<8x32xf32>
    %c1_101 = arith.constant 1 : index
    %c0_102 = arith.constant 0 : index
    %c0_103 = arith.constant 0 : index
    %159 = vector.load %arg15[%c1_101, %c0_102, %c0_103] : memref<2x1x32xf32, #tpu.memory_space<vmem>>, vector<1x1x32xf32>
    %160 = vector.shape_cast %159 : vector<1x1x32xf32> to vector<1x32xf32>
    %161 = vector.broadcast %160 : vector<1x32xf32> to vector<8x32xf32>
    %162 = arith.addf %158, %161 : vector<8x32xf32>
    %163 = vector.shape_cast %162 : vector<8x32xf32> to vector<1x8x32xf32>
    %cst_104 = arith.constant dense<0.000000e+00> : vector<1x32xf32>
    %164 = vector.multi_reduction <add>, %163, %cst_104 [1] : vector<1x8x32xf32> to vector<1x32xf32>
    %cst_105 = arith.constant 8.000000e+00 : f32
    %165 = vector.broadcast %cst_105 : f32 to vector<1x32xf32>
    %166 = arith.divf %164, %165 : vector<1x32xf32>
    %167 = arith.truncf %166 : vector<1x32xf32> to vector<1x32xbf16>
    %c0_106 = arith.constant 0 : index
    %c0_107 = arith.constant 0 : index
    %168 = vector.load %arg16[%c0_106, %c0_107] : memref<32x32xbf16, #tpu.memory_space<vmem>>, vector<32x32xbf16>
    %cst_108 = arith.constant dense<0.000000e+00> : vector<1x32xf32>
    %169 = tpu.matmul %167, %168, %cst_108 {dimension_numbers = #tpu.dot_dimension_numbers<[1], [0], [0], [1], [0, 0, 1, 1], [], []>} : vector<1x32xbf16>, vector<32x32xbf16>, vector<1x32xf32> -> vector<1x32xf32>
    %c0_109 = arith.constant 0 : index
    %c0_110 = arith.constant 0 : index
    %170 = vector.load %arg17[%c0_109, %c0_110] : memref<1x32xf32, #tpu.memory_space<vmem>>, vector<1x32xf32>
    %171 = arith.addf %169, %170 : vector<1x32xf32>
    %cst_111 = arith.constant 0.000000e+00 : f32
    %172 = vector.broadcast %cst_111 : f32 to vector<1x32xf32>
    %173 = arith.maximumf %171, %172 : vector<1x32xf32>
    %174 = arith.truncf %173 : vector<1x32xf32> to vector<1x32xbf16>
    %c0_112 = arith.constant 0 : index
    %c0_113 = arith.constant 0 : index
    %175 = vector.load %arg18[%c0_112, %c0_113] : memref<32x8xbf16, #tpu.memory_space<vmem>>, vector<32x8xbf16>
    %cst_114 = arith.constant dense<0.000000e+00> : vector<1x8xf32>
    %176 = tpu.matmul %174, %175, %cst_114 {dimension_numbers = #tpu.dot_dimension_numbers<[1], [0], [0], [1], [0, 0, 1, 1], [], []>} : vector<1x32xbf16>, vector<32x8xbf16>, vector<1x8xf32> -> vector<1x8xf32>
    %c0_115 = arith.constant 0 : index
    %c0_116 = arith.constant 0 : index
    %177 = vector.load %arg19[%c0_115, %c0_116] : memref<1x8xf32, #tpu.memory_space<vmem>>, vector<1x8xf32>
    %178 = arith.addf %176, %177 : vector<1x8xf32>
    %179 = vector.shape_cast %178 : vector<1x8xf32> to vector<1x1x8xf32>
    %c0_117 = arith.constant 0 : index
    %c0_118 = arith.constant 0 : index
    %c0_119 = arith.constant 0 : index
    %180 = vector.load %arg20[%c0_117, %c0_118, %c0_119] : memref<1x1x8xf32, #tpu.memory_space<vmem>>, vector<1x1x8xf32>
    tpu.vector_store %arg20[%c0_117, %c0_118, %c0_119], %179 {strides = array<i32>} : memref<1x1x8xf32, #tpu.memory_space<vmem>>, vector<1x1x8xf32>,
    return
  }
  func.func @transform_0(%arg0: i32) -> (i32, i32, i32) {
    %c0_i32 = arith.constant 0 : i32
    %c0_i32_0 = arith.constant 0 : i32
    %c0_i32_1 = arith.constant 0 : i32
    return %arg0, %c0_i32, %c0_i32_0 : i32, i32, i32
  }
  func.func @transform_1(%arg0: i32) -> (i32, i32, i32) {
    %c0_i32 = arith.constant 0 : i32
    %c0_i32_0 = arith.constant 0 : i32
    %c0_i32_1 = arith.constant 0 : i32
    return %arg0, %c0_i32, %c0_i32_0 : i32, i32, i32
  }
  func.func @transform_2(%arg0: i32) -> (i32, i32, i32, i32) {
    %c0_i32 = arith.constant 0 : i32
    %c0_i32_0 = arith.constant 0 : i32
    %c0_i32_1 = arith.constant 0 : i32
    %c0_i32_2 = arith.constant 0 : i32
    return %c0_i32, %arg0, %c0_i32_0, %c0_i32_1 : i32, i32, i32, i32
  }
  func.func @transform_3(%arg0: i32) -> (i32, i32, i32) {
    %c0_i32 = arith.constant 0 : i32
    %c0_i32_0 = arith.constant 0 : i32
    %c0_i32_1 = arith.constant 0 : i32
    %c0_i32_2 = arith.constant 0 : i32
    return %c0_i32, %c0_i32_0, %c0_i32_1 : i32, i32, i32
  }
  func.func @transform_4(%arg0: i32) -> (i32, i32, i32) {
    %c0_i32 = arith.constant 0 : i32
    %c0_i32_0 = arith.constant 0 : i32
    %c0_i32_1 = arith.constant 0 : i32
    %c0_i32_2 = arith.constant 0 : i32
    return %c0_i32, %c0_i32_0, %c0_i32_1 : i32, i32, i32
  }
  func.func @transform_5(%arg0: i32) -> (i32, i32, i32) {
    %c0_i32 = arith.constant 0 : i32
    %c0_i32_0 = arith.constant 0 : i32
    %c0_i32_1 = arith.constant 0 : i32
    %c0_i32_2 = arith.constant 0 : i32
    return %c0_i32, %c0_i32_0, %c0_i32_1 : i32, i32, i32
  }
  func.func @transform_6(%arg0: i32) -> (i32, i32, i32) {
    %c0_i32 = arith.constant 0 : i32
    %c0_i32_0 = arith.constant 0 : i32
    %c0_i32_1 = arith.constant 0 : i32
    %c0_i32_2 = arith.constant 0 : i32
    return %c0_i32, %c0_i32_0, %c0_i32_1 : i32, i32, i32
  }
  func.func @transform_7(%arg0: i32) -> (i32, i32, i32) {
    %c0_i32 = arith.constant 0 : i32
    %c0_i32_0 = arith.constant 0 : i32
    %c0_i32_1 = arith.constant 0 : i32
    %c0_i32_2 = arith.constant 0 : i32
    return %c0_i32, %c0_i32_0, %c0_i32_1 : i32, i32, i32
  }
  func.func @transform_8(%arg0: i32) -> (i32, i32, i32) {
    %c0_i32 = arith.constant 0 : i32
    %c0_i32_0 = arith.constant 0 : i32
    %c0_i32_1 = arith.constant 0 : i32
    %c0_i32_2 = arith.constant 0 : i32
    return %c0_i32, %c0_i32_0, %c0_i32_1 : i32, i32, i32
  }
  func.func @transform_9(%arg0: i32) -> (i32, i32, i32) {
    %c0_i32 = arith.constant 0 : i32
    %c0_i32_0 = arith.constant 0 : i32
    %c0_i32_1 = arith.constant 0 : i32
    %c0_i32_2 = arith.constant 0 : i32
    return %c0_i32, %c0_i32_0, %c0_i32_1 : i32, i32, i32
  }
  func.func @transform_10(%arg0: i32) -> (i32, i32, i32) {
    %c0_i32 = arith.constant 0 : i32
    %c0_i32_0 = arith.constant 0 : i32
    %c0_i32_1 = arith.constant 0 : i32
    %c0_i32_2 = arith.constant 0 : i32
    return %c0_i32, %c0_i32_0, %c0_i32_1 : i32, i32, i32
  }
  func.func @transform_11(%arg0: i32) -> (i32, i32, i32) {
    %c0_i32 = arith.constant 0 : i32
    %c0_i32_0 = arith.constant 0 : i32
    %c0_i32_1 = arith.constant 0 : i32
    %c0_i32_2 = arith.constant 0 : i32
    return %c0_i32, %c0_i32_0, %c0_i32_1 : i32, i32, i32
  }
  func.func @transform_12(%arg0: i32) -> (i32, i32, i32) {
    %c0_i32 = arith.constant 0 : i32
    %c0_i32_0 = arith.constant 0 : i32
    %c0_i32_1 = arith.constant 0 : i32
    %c0_i32_2 = arith.constant 0 : i32
    return %c0_i32, %c0_i32_0, %c0_i32_1 : i32, i32, i32
  }
  func.func @transform_13(%arg0: i32) -> (i32, i32, i32) {
    %c0_i32 = arith.constant 0 : i32
    %c0_i32_0 = arith.constant 0 : i32
    %c0_i32_1 = arith.constant 0 : i32
    %c0_i32_2 = arith.constant 0 : i32
    return %c0_i32, %c0_i32_0, %c0_i32_1 : i32, i32, i32
  }
  func.func @transform_14(%arg0: i32) -> (i32, i32, i32) {
    %c0_i32 = arith.constant 0 : i32
    %c0_i32_0 = arith.constant 0 : i32
    %c0_i32_1 = arith.constant 0 : i32
    %c0_i32_2 = arith.constant 0 : i32
    return %c0_i32, %c0_i32_0, %c0_i32_1 : i32, i32, i32
  }
  func.func @transform_15(%arg0: i32) -> (i32, i32) {
    %c0_i32 = arith.constant 0 : i32
    %c0_i32_0 = arith.constant 0 : i32
    %c0_i32_1 = arith.constant 0 : i32
    return %c0_i32, %c0_i32_0 : i32, i32
  }
  func.func @transform_16(%arg0: i32) -> (i32, i32) {
    %c0_i32 = arith.constant 0 : i32
    %c0_i32_0 = arith.constant 0 : i32
    %c0_i32_1 = arith.constant 0 : i32
    return %c0_i32, %c0_i32_0 : i32, i32
  }
  func.func @transform_17(%arg0: i32) -> (i32, i32) {
    %c0_i32 = arith.constant 0 : i32
    %c0_i32_0 = arith.constant 0 : i32
    %c0_i32_1 = arith.constant 0 : i32
    return %c0_i32, %c0_i32_0 : i32, i32
  }
  func.func @transform_18(%arg0: i32) -> (i32, i32) {
    %c0_i32 = arith.constant 0 : i32
    %c0_i32_0 = arith.constant 0 : i32
    %c0_i32_1 = arith.constant 0 : i32
    return %c0_i32, %c0_i32_0 : i32, i32
  }
  func.func @transform_19(%arg0: i32) -> (i32, i32, i32) {
    %c0_i32 = arith.constant 0 : i32
    %c0_i32_0 = arith.constant 0 : i32
    %c0_i32_1 = arith.constant 0 : i32
    return %arg0, %c0_i32, %c0_i32_0 : i32, i32, i32
  }
}

</mosaic_0001>

<bundles_post_ra>
// kernel: tpu_custom_call.1
= control target key start
LH: loop header
LB: loop body
LE: loop exit
PB: predicated region body
PF: predicated region fallthrough
CT: control target
= control target key end

     0   :  { %s4512_s0 = inlined_call_operand.hbm [shape: f32[2,8,32], index: 0, kind: input, shape index: {}]   ;;  %s4513_s1 = inlined_call_operand.vmem [shape: bf16[2,64,32], index: 1, kind: input, shape index: {}]   ;;  %s4514_s2 = inlined_call_operand.hbm [shape: f32[2,2,1,64], index: 2, kind: input, shape index: {}]   ;;  %s4515_s3 = inlined_call_operand.vmem [shape: bf16[2,64,192], index: 3, kind: input, shape index: {}]   ;;  %s4516_s4 = inlined_call_operand.hbm [shape: f32[2,1,192], index: 4, kind: input, shape index: {}]   ;;  %s4517_s5 = inlined_call_operand.hbm [shape: bf16[2,32,64], index: 5, kind: input, shape index: {}]   ;;  %s4518_s6 = inlined_call_operand.vmem [shape: f32[2,1,64], index: 6, kind: input, shape index: {}]   ;;  %s4519_s7 = inlined_call_operand.vmem [shape: bf16[2,64,64], index: 7, kind: input, shape index: {}]   ;;  %s4520_s8 = inlined_call_operand.hbm [shape: f32[2,1,64], index: 8, kind: input, shape index: {}]   ;;  %s4521_s9 = inlined_call_operand.hbm [shape: bf16[2,64,64], index: 9, kind: input, shape index: {}]   ;;  %s4522_s10 = inlined_call_operand.vmem [shape: f32[2,1,64], index: 10, kind: input, shape index: {}]   ;;  %s4523_s11 = inlined_call_operand.hbm [shape: bf16[2,64,64], index: 11, kind: input, shape index: {}]   ;;  %s4524_s12 = inlined_call_operand.vmem [shape: f32[2,1,64], index: 12, kind: input, shape index: {}]   ;;  %s4525_s13 = inlined_call_operand.vmem [shape: bf16[2,64,32], index: 13, kind: input, shape index: {}]   ;;  %s4526_s14 = inlined_call_operand.vmem [shape: f32[2,1,32], index: 14, kind: input, shape index: {}]   ;;  %s4527_s15 = inlined_call_operand.vmem [shape: bf16[32,32], index: 15, kind: input, shape index: {}]   ;;  %s4528_s16 = inlined_call_operand.vmem [shape: f32[1,32], index: 16, kind: input, shape index: {}]   ;;  %s4529_s17 = inlined_call_operand.vmem [shape: bf16[32,8], index: 17, kind: input, shape index: {}]   ;;  %s4530_s18 = inlined_call_operand.vmem [shape: f32[1,8], index: 18, kind: input, shape index: {}]   ;;  %s4531_s19 = inlined_call_operand.hbm [shape: f32[2,1,8], index: 19, kind: output, shape index: {}]  }
   0x1   :  { %4549 = sst [smem:[#allocation21_spill]] %s4512_s0 }
   0x2   :  { %4550 = sst [smem:[#allocation22_spill]] %s4513_s1 }
   0x3   :  { %4551 = sst [smem:[#allocation23_spill]] %s4514_s2 }
   0x4   :  { %4552 = sst [smem:[#allocation24_spill]] %s4515_s3 }
   0x5   :  { %4553 = sst [smem:[#allocation25_spill]] %s4516_s4 }
   0x6   :  { %4554 = sst [smem:[#allocation26_spill]] %s4517_s5 }
   0x7   :  { %4555 = sst [smem:[#allocation27_spill]] %s4520_s8 }
   0x8   :  { %4556 = sst [smem:[#allocation28_spill]] %s4521_s9 }
   0x9   :  { %4557 = sst [smem:[#allocation29_spill]] %s4523_s11 }
   0xa   :  { %4558 = sst [smem:[#allocation30_spill]] %s4524_s12 }
   0xb   :  { %4559 = sst [smem:[#allocation31_spill]] %s4526_s14 }
   0xc   :  { %4560 = sst [smem:[#allocation32_spill]] %s4527_s15 }
   0xd   :  { %4561 = sst [smem:[#allocation33_spill]] %s4528_s16 }
   0xe   :  { %4562 = sst [smem:[#allocation34_spill]] %s4529_s17 }
   0xf   :  { %4563 = sst [smem:[#allocation35_spill]] %s4530_s18 }
  0x10   :  { %4564 = sst [smem:[#allocation36_spill]] %s4531_s19 }
  0x11   :  { %24 = vsyncpa [#allocation3], 0 }
  0x12   :  { %26 = vsyncpa [#allocation3 + $0x1], 0 }
  0x13   :  { %27 = vsyncpa [#allocation6], 0 }
  0x14   :  { %29 = vsyncpa [#allocation6 + $0x1], 0 }
  0x15   :  { %30 = vsyncpa [#allocation9], 0 }
  0x16   :  { %31 = vsyncpa [#allocation12], 0 }
  0x17   :  { %32 = vsyncpa [#allocation4], 0 }
  0x18   :  { %34 = vsyncpa [#allocation4 + $0x1], 0  ;;  %s3767_s0 = smov 0   ;;  %s3769_s30 = smov 0  }
  0x19   :  { %s3771_s20 = smov 0   ;;  %s3773_s21 = smov 0  }
  0x1a LB: > { %s3647_s1 = smov [#allocation7]   ;;  %s3788_s2 = sadd.s32 4294967295, %s3645_s21   ;;  %s3645_s21 = sphi %s3773_s21, %s4608_s21   ;;  %s3641_s20 = sphi %s3771_s20, %s4607_s20   ;;  %s3637_s30 = sphi %s3769_s30, %s4606_s30   ;;  %s3633_s0 = sphi %s3767_s0, %s4605_s0  }
  0x1b   : > { %s500_s22 = sshll.u32 %s3647_s1, 4  ;;  %p2795_p0 = scmp.ge.s32.totalorder %s3645_s21, 1  ;;  %s3793_s22 = int_to_ptr.vmem [resolvable:$true] %s500_s22 }
  0x1c   : > { %p4540_p1 = scmp.eq.s32.totalorder %s3788_s2, 0  ;;  %p485_p2 = scmp.lt.s32.totalorder %s3645_s21, 3 }
  0x1d   : > { %s3648_s24 = smov [#allocation8]   ;;  %s3649_s26 = smov [#allocation11]  }
  0x1e   : > { %p3795_p3 = pnand %p2795_p0, %p485_p2  ;;  %s513_s25 = sshll.u32 %s3648_s24, 4  ;;  %s3808_s25 = int_to_ptr.vmem [resolvable:$true] %s513_s25 }
  0x1f   : > { %s3810_s27 = sshll.u32 %s3649_s26, 4  ;;  %s4567_s4 = sld [smem:[#allocation25_spill]]  ;;  %s546_s27 = int_to_ptr.vmem [resolvable:$true] %s3810_s27 }
  0x20   : > { %s4565_s23 = scalar_select %p3795_p3, 1, 0 }
  0x21   : > { %p3207_p5 = pneg %p3795_p3 }
  0x23   : > { %p3804_p6 = pnand %p3207_p5, %p4540_p1 }
  0x25   : > { %s3363_s1 = scalar_lea.hbm %s4567_s4, 64  ;;  %p3820_p8 = pneg %p3804_p6 }
  0x26   : > { %p3364_p7 = scmp.ne.s32.totalorder %s4567_s4, %s3363_s1  ;;  %p3370_p11 = scmp.lt.u32.totalorder %s3363_s1, %s4567_s4 }
  0x28   : > { %p3366_p9 = pnand %p3820_p8, %p3364_p7 }
  0x2a   : > { %p3367_p10 = pneg %p3366_p9 }
  0x2c   : > { %p3372_p12 = pnand %p3370_p11, %p3367_p10 }
  0x2e   : > { %3375 = shalt.err (!%p3372_p12)
}
  0x2f   : > { %s3376_s18 = scalar_lea.vmem %s3793_s22, 64  ;;  %p3384_p5 = scmp.lt.s32.totalorder %s3793_s22, %s3793_s22 }
  0x30   : > { %p3377_p13 = scmp.ne.s32.totalorder %s3793_s22, %s3376_s18  ;;  %p3385_p4 = scmp.lt.s32.totalorder %s3376_s18, %s3376_s18 }
  0x32   : > { %p3379_p0 = pnand %p3377_p13, %p3820_p8  ;;  %p3386_p7 = por %p3385_p4, %p3384_p5 }
  0x34   : > { %p3380_p2 = pneg %p3379_p0 }
  0x36   : > { %p3387_p9 = pnand %p3386_p7, %p3380_p2 }
  0x38   : > { %3390 = shalt.err (!%p3387_p9)
}
  0x39   : > { %s4542_s19 = smov 32   ;;  %s3651_s16 = smov 2  }
  0x3a   : > { %3210 = dma.hbm_to_vmem [thread:$0]  (!%p3804_p6), %s4567_s4, 64, %s3793_s22, [#allocation6], %s4542_s19, %s4542_s19, %s3651_s16  }
  0x3b   : > { %s4569_s5 = sld [smem:[#allocation26_spill]] }
  0x41   : > { %s3391_s17 = scalar_lea.hbm %s4569_s5, 512 }
  0x42   : > { %p3392_p4 = scmp.ne.s32.totalorder %s4569_s5, %s3391_s17  ;;  %p3398_p12 = scmp.lt.u32.totalorder %s3391_s17, %s4569_s5 }
  0x44   : > { %p3394_p10 = pnand %p3392_p4, %p3820_p8 }
  0x46   : > { %p3395_p11 = pneg %p3394_p10 }
  0x48   : > { %p3400_p13 = pnand %p3398_p12, %p3395_p11 }
  0x4a   : > { %3403 = shalt.err (!%p3400_p13)
}
  0x4b   : > { %s3404_s22 = scalar_lea.vmem %s3808_s25, 512  ;;  %p3412_p7 = scmp.lt.s32.totalorder %s3808_s25, %s3808_s25 }
  0x4c   : > { %p3405_p0 = scmp.ne.s32.totalorder %s3808_s25, %s3404_s22  ;;  %p3413_p9 = scmp.lt.s32.totalorder %s3404_s22, %s3404_s22 }
  0x4e   : > { %p3407_p2 = pnand %p3405_p0, %p3820_p8  ;;  %p3414_p4 = por %p3413_p9, %p3412_p7 }
  0x50   : > { %p3408_p5 = pneg %p3407_p2 }
  0x52   : > { %p3415_p10 = pnand %p3414_p4, %p3408_p5 }
  0x54   : > { %3418 = shalt.err (!%p3415_p10)
}
  0x55   : > { %s4543_s15 = smov 64   ;;  %s4544_s12 = smov 4  }
  0x56   : > { %3213 = dma.hbm_to_vmem [thread:$0]  (!%p3804_p6), %s4569_s5, 512, %s3808_s25, [#allocation9], %s4543_s15, %s4543_s15, %s4544_s12  }
  0x57   : > { %s4570_s9 = sld [smem:[#allocation28_spill]] }
  0x5d   : > { %s3419_s29 = scalar_lea.hbm %s4570_s9, 1024 }
  0x5e   : > { %p3420_p11 = scmp.ne.s32.totalorder %s4570_s9, %s3419_s29  ;;  %p3426_p0 = scmp.lt.u32.totalorder %s3419_s29, %s4570_s9 }
  0x60   : > { %p3422_p12 = pnand %p3420_p11, %p3820_p8 }
  0x62   : > { %p3423_p13 = pneg %p3422_p12 }
  0x64   : > { %p3428_p2 = pnand %p3426_p0, %p3423_p13 }
  0x66   : > { %3431 = shalt.err (!%p3428_p2)
}
  0x67   : > { %s3432_s14 = scalar_lea.vmem %s546_s27, 1024  ;;  %p3440_p4 = scmp.lt.s32.totalorder %s546_s27, %s546_s27 }
  0x68   : > { %p3433_p5 = scmp.ne.s32.totalorder %s546_s27, %s3432_s14  ;;  %p3441_p10 = scmp.lt.s32.totalorder %s3432_s14, %s3432_s14 }
  0x6a   : > { %p3435_p7 = pnand %p3433_p5, %p3820_p8  ;;  %p3442_p1 = por %p3441_p10, %p3440_p4 }
  0x6c   : > { %p3436_p9 = pneg %p3435_p7 }
  0x6e   : > { %p3443_p3 = pnand %p3442_p1, %p3436_p9 }
  0x70   : > { %3446 = shalt.err (!%p3443_p3)
}
  0x71   : > { %3219 = dma.hbm_to_vmem [thread:$0]  (!%p3804_p6), %s4570_s9, 1024, %s546_s27, [#allocation12], %s4543_s15, %s4543_s15, %s4544_s12  }
  0x72   : > { %s3654_s16 = smov [#allocation10]   ;;  %s4571_s8 = sld [smem:[#allocation27_spill]] }
  0x73   : > { %s532_s28 = sshll.u32 %s3654_s16, 4  ;;  %s533_s28 = int_to_ptr.vmem [resolvable:$true] %s532_s28 }
  0x78   : > { %s3447_s26 = scalar_lea.hbm %s4571_s8, 32 }
  0x79   : > { %p3448_p1 = scmp.ne.s32.totalorder %s4571_s8, %s3447_s26  ;;  %p3454_p12 = scmp.lt.u32.totalorder %s3447_s26, %s4571_s8 }
  0x7b   : > { %p3450_p3 = pnand %p3448_p1, %p3820_p8 }
  0x7d   : > { %p3451_p11 = pneg %p3450_p3 }
  0x7f   : > { %p3456_p13 = pnand %p3454_p12, %p3451_p11 }
  0x81   : > { %3459 = shalt.err (!%p3456_p13)
}
  0x82   : > { %s3460_s27 = scalar_lea.vmem %s533_s28, 32  ;;  %p3468_p7 = scmp.lt.s32.totalorder %s533_s28, %s533_s28 }
  0x83   : > { %p3461_p0 = scmp.ne.s32.totalorder %s533_s28, %s3460_s27  ;;  %p3469_p9 = scmp.lt.s32.totalorder %s3460_s27, %s3460_s27 }
  0x85   : > { %p3463_p2 = pnand %p3461_p0, %p3820_p8  ;;  %p3470_p4 = por %p3469_p9, %p3468_p7 }
  0x87   : > { %p3464_p5 = pneg %p3463_p2 }
  0x89   : > { %p3471_p10 = pnand %p3470_p4, %p3464_p5 }
  0x8b   : > { %3474 = shalt.err (!%p3471_p10)
}
  0x8c   : > { %s4545_s25 = smov 16   ;;  %s4546_s17 = smov 1  }
  0x8d   : > { %3216 = dma.hbm_to_vmem [thread:$0]  (!%p3804_p6), %s4571_s8, 32, %s533_s28, [#allocation9], %s4545_s25, %s4545_s25, %s4546_s17  }
  0x8e   : > { %s3657_s29 = smov [#allocation13]   ;;  %s4572_s11 = sld [smem:[#allocation29_spill]] }
  0x8f   : > { %s561_s1 = sshll.u32 %s3657_s29, 4  ;;  %s562_s1 = int_to_ptr.vmem [resolvable:$true] %s561_s1 }
  0x94   : > { %s3475_s22 = scalar_lea.hbm %s4572_s11, 1024 }
  0x95   : > { %p3476_p1 = scmp.ne.s32.totalorder %s4572_s11, %s3475_s22  ;;  %p3482_p12 = scmp.lt.u32.totalorder %s3475_s22, %s4572_s11 }
  0x97   : > { %p3478_p3 = pnand %p3476_p1, %p3820_p8 }
  0x99   : > { %p3479_p11 = pneg %p3478_p3 }
  0x9b   : > { %p3484_p13 = pnand %p3482_p12, %p3479_p11 }
  0x9d   : > { %3487 = shalt.err (!%p3484_p13)
}
  0x9e   : > { %s3488_s28 = scalar_lea.vmem %s562_s1, 1024  ;;  %p3496_p7 = scmp.lt.s32.totalorder %s562_s1, %s562_s1 }
  0x9f   : > { %p3489_p0 = scmp.ne.s32.totalorder %s562_s1, %s3488_s28  ;;  %p3497_p9 = scmp.lt.s32.totalorder %s3488_s28, %s3488_s28 }
  0xa1   : > { %p3491_p2 = pnand %p3489_p0, %p3820_p8  ;;  %p3498_p4 = por %p3497_p9, %p3496_p7 }
  0xa3   : > { %p3492_p5 = pneg %p3491_p2 }
  0xa5   : > { %p3499_p10 = pnand %p3498_p4, %p3492_p5 }
  0xa7   : > { %3502 = shalt.err (!%p3499_p10)
}
  0xa8   : > { %s4573_s19 = smov 4   ;;  %s4574_s16 = smov 64  }
  0xa9   : > { %3222 = dma.hbm_to_vmem [thread:$0]  (!%p3804_p6), %s4572_s11, 1024, %s562_s1, [#allocation12], %s4574_s16, %s4574_s16, %s4573_s19  }
  0xaa   : > { %s2794_s3 = sadd.s32 4294967294, %s3645_s21   ;;  %s3935_s24 = sadd.s32 1, %s3645_s21  }
  0xab   : > { %s47_s29 = sadd.s32 1, %s3641_s20  ;;  %s44_s26 = ssub.s32 %s3645_s21, %s3935_s24 }
  0xac   : > { %p54_p8 = scmp.ne.s32.totalorder %s3641_s20, %s3637_s30  ;;  %p45_p1 = scmp.eq.s32.totalorder %s44_s26, 0 }
  0xad   : > { %p55_p3 = scmp.eq.s32.totalorder %s3645_s21, 0  ;;  %p60_p11 = scmp.ne.s32.totalorder %s3637_s30, %s3633_s0 }
  0xae   : > { %p472_p12 = scmp.eq.s32.totalorder %s3788_s2, 1  ;;  %p4575_p0 = scmp.eq.s32.totalorder %s3788_s2, 0 }
  0xaf   : > { %s3947_s18 = scalar_select %p45_p1, %s3641_s20, %s47_s29  }
  0xb0   : > { %p56_p13 = por %p55_p3, %p54_p8  ;;  %p3951_p2 = por %p4575_p0, %p60_p11 }
  0xb1   : > { %p3955_p6 = por %p472_p12, %p54_p8  ;;  %p478_p5 = scmp.eq.s32.totalorder %s2794_s3, 1 }
  0xb2   : > { %p3239_p7 = scmp.lt.s32.totalorder %s3645_s21, 2  ;;  %s3961_s14 = sand.u32 1, %s3641_s20  }
  0xb3   : > { %s4577_s1 = scalar_select %p3955_p6, 1, 0 }
  0xb4   : > { %p3963_p9 = por %p478_p5, %p60_p11  ;;  %s2802_s28 = sshll.u32 %s3961_s14, 3 }
  0xb5   : > { %s2803_s19 = sshll.u32 %s3645_s21, 7  ;;  %s4579_s12 = sld [smem:[#allocation21_spill]] }
  0xb6   : > { %s4578_s27 = scalar_select %p3963_p9, 1, 0 }
  0xb7   : > { %s600_s3 = scalar_lea.vmem [#allocation2], %s2802_s28  ;;  %p3974_p4 = pnand %p3239_p7, %p56_p13 }
  0xb8   : > { %s607_s26 = sshll.u32 %s600_s3, 4  ;;  %s597_s4 = scalar_lea.sflag [#allocation3], %s3961_s14  ;;  %s3978_s26 = int_to_ptr.vmem [resolvable:$true] %s607_s26 }
  0xb9   : > { %p3505_p8 = pneg %p3974_p4 }
  0xbb   : > { %s3972_s29 = scalar_lea.hbm %s4579_s12, %s2803_s19  ;;  %s3508_s16 = scalar_lea.hbm %s4579_s12, 256 }
  0xbc   : > { %s3503_s5 = scalar_lea.hbm %s3972_s29, 128  ;;  %p3509_p11 = scmp.lt.u32.totalorder %s3972_s29, %s4579_s12 }
  0xbd   : > { %p3504_p10 = scmp.ne.s32.totalorder %s3972_s29, %s3503_s5  ;;  %p3510_p12 = scmp.lt.u32.totalorder %s3508_s16, %s3503_s5 }
  0xbe   : > { %p3512_p0 = scmp.lt.u32.totalorder %s3503_s5, %s3972_s29 }
  0xbf   : > { %p3506_p1 = pnand %p3505_p8, %p3504_p10  ;;  %p3511_p13 = por %p3510_p12, %p3509_p11 }
  0xc1   : > { %p3507_p3 = pneg %p3506_p1  ;;  %p3513_p5 = por %p3512_p0, %p3511_p13 }
  0xc3   : > { %p3514_p7 = pnand %p3513_p5, %p3507_p3 }
  0xc5   : > { %3517 = shalt.err (!%p3514_p7)
}
  0xc6   : > { %s3518_s17 = scalar_lea.vmem %s3978_s26, 128  ;;  %s3658_s28 = smov [#allocation2]  }
  0xc7   : > { %p3519_p10 = scmp.ne.s32.totalorder %s3978_s26, %s3518_s17  ;;  %s3523_s19 = sshll.u32 %s3658_s28, 4  ;;  %s3524_s19 = int_to_ptr.vmem [resolvable:$false] %s3523_s19 }
  0xc8   : > { %s3525_s15 = scalar_lea.vmem %s3524_s19, 256  ;;  %p3526_p6 = scmp.lt.s32.totalorder %s3978_s26, %s3524_s19 }
  0xc9   : > { %p3521_p1 = pnand %p3519_p10, %p3505_p8  ;;  %p3527_p11 = scmp.lt.s32.totalorder %s3525_s15, %s3518_s17 }
  0xcb   : > { %p3522_p9 = pneg %p3521_p1  ;;  %p3528_p12 = por %p3527_p11, %p3526_p6 }
  0xcd   : > { %p3529_p13 = pnand %p3528_p12, %p3522_p9 }
  0xcf   : > { %3532 = shalt.err (!%p3529_p13)
}
  0xd0   : > { %3226 = dma.hbm_to_vmem [thread:$0]  (!%p3974_p4), %s3972_s29, 128, %s3978_s26, %s597_s4  }
  0xd1   : > { %s4581_s5 = sshll.u32 %s3961_s14, 1  ;;  %s622_s28 = sand.u32 1, %s3645_s21  }
  0xd2   : > { %s626_s16 = scalar_lea.vmem [#allocation5], %s4581_s5  ;;  %s2805_s19 = sshll.u32 %s3645_s21, 4 }
  0xd3   : > { %s632_s3 = sshll.u32 %s626_s16, 4  ;;  %s4582_s8 = sld [smem:[#allocation23_spill]]  ;;  %s4010_s3 = int_to_ptr.vmem [resolvable:$true] %s632_s3 }
  0xd4   : > { %s4018_s11 = scalar_lea.sflag [#allocation6], %s622_s28 }
  0xd9   : > { %s4016_s9 = scalar_lea.hbm %s4582_s8, %s2805_s19  ;;  %s3538_s29 = scalar_lea.hbm %s4582_s8, 64 }
  0xda   : > { %s3533_s12 = scalar_lea.hbm %s4016_s9, 32  ;;  %p3539_p0 = scmp.lt.u32.totalorder %s4016_s9, %s4582_s8 }
  0xdb   : > { %p3534_p6 = scmp.ne.s32.totalorder %s4016_s9, %s3533_s12  ;;  %p3540_p5 = scmp.lt.u32.totalorder %s3538_s29, %s3533_s12 }
  0xdc   : > { %p3542_p10 = scmp.lt.u32.totalorder %s3533_s12, %s4016_s9 }
  0xdd   : > { %p3536_p9 = pnand %p3534_p6, %p3505_p8  ;;  %p3541_p7 = por %p3540_p5, %p3539_p0 }
  0xdf   : > { %p3537_p3 = pneg %p3536_p9  ;;  %p3543_p1 = por %p3542_p10, %p3541_p7 }
  0xe1   : > { %p3544_p11 = pnand %p3543_p1, %p3537_p3 }
  0xe3   : > { %3547 = shalt.err (!%p3544_p11)
}
  0xe4   : > { %s3548_s16 = scalar_lea.vmem %s4010_s3, 32  ;;  %s3659_s28 = smov [#allocation5]  }
  0xe5   : > { %p3549_p12 = scmp.ne.s32.totalorder %s4010_s3, %s3548_s16  ;;  %s3553_s19 = sshll.u32 %s3659_s28, 4  ;;  %s3554_s19 = int_to_ptr.vmem [resolvable:$false] %s3553_s19 }
  0xe6   : > { %s3555_s17 = scalar_lea.vmem %s3554_s19, 64  ;;  %p3556_p9 = scmp.lt.s32.totalorder %s4010_s3, %s3554_s19 }
  0xe7   : > { %p3551_p13 = pnand %p3549_p12, %p3505_p8  ;;  %p3557_p0 = scmp.lt.s32.totalorder %s3555_s17, %s3548_s16 }
  0xe9   : > { %p3552_p6 = pneg %p3551_p13  ;;  %p3558_p5 = por %p3557_p0, %p3556_p9 }
  0xeb   : > { %p3559_p7 = pnand %p3558_p5, %p3552_p6 }
  0xed   : > { %3562 = shalt.err (!%p3559_p7)
}
  0xee   : > { %s4583_s12 = smov 1   ;;  %s4584_s15 = smov 16  }
  0xef   : > { %s4585_s4 = smov 32   ;;  %p4586_p8 = scmp.ne.s32.totalorder %s4565_s23, 0 }
  0xf0   : > { %3229 = dma.hbm_to_vmem [thread:$0]  (!%p3974_p4), %s4016_s9, 32, %s4010_s3, %s4018_s11, %s4585_s4, %s4584_s15, %s4583_s12  }
  0xf1   : > { %644 = sbr.rel (%p4586_p8) target bundleno = 3352 (0xd18), region = 96  ;;  %s4050_s14 = sand.u32 (!%p4586_p8), 1, %s3637_s30  }
  0xf2   : > { %s2807_s29 = sshll.u32 (!%p4586_p8), %s4050_s14, 3  ;;  %s647_s26 = scalar_lea.sflag (!%p4586_p8), [#allocation3], %s4050_s14 }
  0xf3   : > { %s4054_s5 = scalar_lea.vmem (!%p4586_p8), [#allocation2], %s2807_s29 }
  0xf8   : > { %3608 = dma.done.wait (%p3951_p2), %s647_s26, 128  }
  0xf9   : > { %3610 = vsyncadd (%p3951_p2), %s647_s26, 4294967168  ;;  %s655_s9 = sand.u32 1, %s3788_s2   ;;  %s2808_s11 = sshll.u32 %s4050_s14, 1 }
  0xfa   : > { %s656_s23 = scalar_lea.sflag [#allocation6], %s655_s9  ;;  %s4062_s25 = scalar_lea.vmem [#allocation5], %s2808_s11 }
  0xfb   : > { %3612 = dma.done.wait (%p3951_p2), %s656_s23, 32  }
  0xfc   : > { %3614 = vsyncadd (%p3951_p2), %s656_s23, 4294967264  ;;  %p4587_p4 = scmp.eq.s32.totalorder %s3788_s2, 0 }
  0xfe   : > { %3616 = dma.done.wait (%p4587_p4), [#allocation6], 64   ;;  %p4588_p3 = pmov %p4587_p4 }
 0x100   : > { %3618 = vsyncadd (%p4588_p3), [#allocation6], 4294967232  ;;  %p4589_p10 = pmov %p4588_p3 }
 0x101   : > { %p4590_p1 = pmov %p4588_p3 }
 0x102   : > { %3620 = dma.done.wait (%p4589_p10), [#allocation9], 544  }
 0x103   : > { %3622 = vsyncadd (%p4590_p1), [#allocation9], 4294966752  ;;  %p4591_p11 = pmov %p4590_p1 }
 0x104   : > { %p4592_p12 = pmov %p4590_p1 }
 0x105   : > { %3624 = dma.done.wait (%p4591_p11), [#allocation12], 2048  }
 0x106   : > { %3626 = vsyncadd (%p4592_p12), [#allocation12], 4294965248  ;;  %p743_p2 = scmp.lt.s32.totalorder %s3788_s2, 1  ;;  %v3660_v0 = vmov 0   ;;  %s4593_s19 = sld [smem:[#allocation24_spill]]  ;;  %v3297_v2 = vld [vmem:[#allocation8] sm:$0xff]   ;;  %v771_v19 = vlaneseq }
 0x107   : > { %857 = vmatprep.mubr.bf16.mxu0 %v3660_v0  ;;  %s4594_s29 = sld [smem:[#allocation22_spill]]  ;;  %3029 = vmatprep.subr.bf16.mxu1 %v3297_v2  ;;  %v3301_v5 = vld [vmem:[#allocation8 + $0x8] sm:$0xff]   ;;  %vm758_vm0 = vcmask 261120   ;;  %vm821_vm1 = vcmask 523264   ;;  %v3661_v21 = vmov 1966171168  }
 0x108   : > { %s744_s22 = scalar_select %p743_p2, %s3788_s2, 1  ;;  %3030 = vmatpush3.bf16.msra.mxu1 %v3297_v2  ;;  %v4119_v14 = vld [vmem:[%s4054_s5] sm:$0xff]  ;;  %v4135_v20 = vshrl.u32 %v771_v19, 7  ;;  %v1007_v22 = vunpack.c.l.s4 %v3661_v21  ;;  %v769_v28 = vld [vmem:[#allocation7] sm:$0x3]  ;;  %vm3664_vm2 = vmmov 0  }
 0x109   : > { %3031 = vmatprep.subr.bf16.mxu1 %v3301_v5  ;;  %v759_v15 = vsel %vm758_vm0, %v4119_v14, 0.0  ;;  %v3313_v18 = vld [vmem:[%s4519_s7] sm:$0xff]   ;;  %v3314_v46 = vld [vmem:[%s4519_s7 + $0x8] sm:$0xff]   ;;  %s3662_s12 = smov 64   ;;  %s4595_s17 = sld [smem:[#allocation30_spill]]  ;;  %vm2631_vm3 = vcmask 57344  }
 0x10a   : > { %s2958_s3 = sshll.u32 %s744_s22, 5  ;;  %v760_v17 = vpack.c.bf16 %v759_v15, %v759_v15  ;;  %v4138_v25 = vsub.s32 0, %v4135_v20  ;;  %v2825_v26 = vld [vmem:[%s4518_s6] ss:$0 sm:$0xff]  ;;  %v777_v29 = vsub.s32 1, %v4135_v20  ;;  %v1008_v31 = vunpack.c.0.s8 %v1007_v22  ;;  %s4596_s11 = sld [smem:[#allocation31_spill]] }
 0x10b   : > { %s3665_s23 = smov 32   ;;  %s4598_s28 = sld [smem:[#allocation34_spill]] }
 0x10c   : > { %v3295_v1 = vld [vmem:[%s4593_s19 + $0x4] ss:$8 sps:$4 sm:$0xff]   ;;  %v3298_v3 = vld [vmem:[%s4593_s19] ss:$8 sps:$4 sm:$0xff]   ;;  %v3299_v4 = vld [vmem:[%s4593_s19 + $0x14] ss:$8 sps:$4 sm:$0xff]   ;;  %3032 = vmatpush3.bf16.msra.mxu1 %v3301_v5  ;;  %v774_v33 = vrot.slane %v769_v28, %v4138_v25  ;;  %v778_v36 = vrot.slane %v769_v28, %v777_v29  ;;  %v4148_v38 = vsub.s32 %v1008_v31, %v4135_v20 }
 0x10d   : > { %825 = vmatprep.subr.bf16.mxu0 %v3295_v1  ;;  %s747_s26 = scalar_lea.vmem %s4594_s29, %s2958_s3  ;;  %v3302_v6 = vld [vmem:[%s4593_s19 + $0x10] ss:$8 sps:$4 sm:$0xff]   ;;  %v3304_v8 = vld [vmem:[%s4593_s19 + $0x24] ss:$8 sps:$4 sm:$0xff]   ;;  %v3307_v10 = vld [vmem:[%s4593_s19 + $0x20] ss:$8 sps:$4 sm:$0xff]   ;;  %3041 = vmatprep.subr.bf16.mxu1 %v3313_v18 }
 0x10e   : > { %826 = vmatpush1.bf16.msra.mxu0 %v3298_v3  ;;  %v4098_v7 = vld [vmem:[%s747_s26] sm:$0xff]   ;;  %v4105_v9 = vld [vmem:[%s747_s26 + $0x8] sm:$0xff]   ;;  %v3308_v11 = vld [vmem:[%s4593_s19 + $0x34] ss:$8 sps:$4 sm:$0xff]   ;;  %s4600_s16 = sld [smem:[#allocation35_spill]]  ;;  %s2955_s3 = sshll.u32 %s3788_s2, 4 }
 0x10f   : > { %827 = vmatprep.subr.bf16.mxu0 %v3299_v4  ;;  %3033 = vmatprep.mubr.msk.bf16.mxu1 %vm758_vm0, %v4098_v7  ;;  %v3310_v12 = vld [vmem:[%s4593_s19 + $0x30] ss:$8 sps:$4 sm:$0xff]   ;;  %s742_s15 = scalar_lea.vmem [#allocation14], %s4050_s14  ;;  %s4601_s9 = sld [smem:[#allocation36_spill]] }
 0x110   : > { %v4116_v13 = vld [vmem:[%s747_s26 + $0x10] sm:$0xff]   ;;  %3034 = vmatmul.mubr.msk.bf16.vlgmr.msra.gmra.mrb[0].mxu1 %vm758_vm0, %v4105_v9  ;;  %v4127_v16 = vld [vmem:[%s747_s26 + $0x18] sm:$0xff]   ;;  %s2646_s4 = sshll.u32 %s742_s15, 4  ;;  %s2634_s2 = scalar_lea.sflag [#allocation4], %s4050_s14  ;;  %s4470_s4 = int_to_ptr.vmem [resolvable:$true] %s2646_s4 }
 0x111   : > { %3037 = vmatprep.mubr.msk.bf16.mxu1 %vm758_vm0, %v4116_v13  ;;  %3042 = vmatpush3.bf16.msra.mxu1 %v3313_v18  ;;  %v3315_v4 = vld [vmem:[%s4519_s7 + $0x10] sm:$0xff]   ;;  %p4602_p6 = scmp.ne.s32.totalorder %s4577_s1, 0 }
 0x112   : > { %828 = vmatpush1.bf16.msra.mxu0 %v3302_v6  ;;  %3043 = vmatprep.subr.bf16.mxu1 %v3314_v46 }
 0x113   : > { %829 = vmatprep.subr.bf16.mxu0 %v3304_v8 }
 0x115   : > { %3044 = vmatpush3.bf16.msra.mxu1 %v3314_v46  ;;  %s4468_s26 = scalar_lea.hbm %s4601_s9, %s2955_s3 }
 0x116   : > { %830 = vmatpush1.bf16.msra.mxu0 %v3307_v10  ;;  %3045 = vmatprep.subr.bf16.mxu1 %v3315_v4 }
 0x117   : > { %831 = vmatprep.subr.bf16.mxu0 %v3308_v11 }
 0x118   : > { %3038 = vmatmul.mubr.msk.bf16.gmra.mrb[4].mxu1 %vm758_vm0, %v4127_v16 }
 0x119   : > { %3046 = vmatpush3.bf16.msra.mxu1 %v3315_v4 }
 0x11a   : > { %832 = vmatpush1.bf16.msra.mxu0 %v3310_v12 }
 0x11d   : > { %2824 = vmatmul.mubr.msk.bf16.vlgmr.msra.gmra.mrb[0].mxu0 %vm821_vm1, %v760_v17 }
 0x1e3   : > { %v3035_v23 = vpop.f32.mrb[0].mxu1 }
 0x1e4   : > { %v955_v24 = vpop.f32.mrb[1].mxu1  ;;  %v964_v34 = vadd.f32 %v3035_v23, %v2825_v26 }
 0x1e5   : > { %v3036_v27 = vpop.f32.mrb[2].mxu1  ;;  %v956_v32 = vadd.f32 %v2825_v26, %v955_v24 }
 0x1e6   : > { %v958_v30 = vpop.f32.mrb[3].mxu1  ;;  %v967_v37 = vadd.f32 %v3036_v27, %v2825_v26  ;;  %v989_v47 = vpack.c.bf16 %v964_v34, %v964_v34 }
 0x1e7   : > { %v959_v35 = vadd.f32 %v2825_v26, %v958_v30  ;;  %v987_v41 = vpack.c.bf16 %v956_v32, %v956_v32 }
 0x1e8   : > { %v990_v53 = vpack.c.bf16 %v967_v37, %v967_v37  ;;  %v3316_v37 = vld [vmem:[%s4519_s7 + $0x18] sm:$0xff]  }
 0x1e9   : > { %v988_v48 = vpack.c.bf16 %v959_v35, %v959_v35  ;;  %3047 = vmatprep.subr.bf16.mxu1 %v3316_v37 }
 0x1ea   : > { %3048 = vmatpush3.bf16.msra.mxu1 %v3316_v37 }
 0x1eb   : > { %v3039_v40 = vpop.f32.mrb[4].mxu1 }
 0x1ec   : > { %v980_v43 = vadd.f32 %v3039_v40, %v2825_v26  ;;  %v971_v45 = vpop.f32.mrb[5].mxu1 }
 0x1ed   : > { %v972_v50 = vadd.f32 %v2825_v26, %v971_v45  ;;  %v3040_v52 = vpop.f32.mrb[6].mxu1 }
 0x1ee   : > { %v974_v58 = vpop.f32.mrb[7].mxu1  ;;  %v993_v59 = vpack.c.bf16 %v980_v43, %v980_v43  ;;  %v983_v61 = vadd.f32 %v3040_v52, %v2825_v26 }
 0x1ef   : > { %v991_v60 = vpack.c.bf16 %v972_v50, %v972_v50  ;;  %v975_v62 = vadd.f32 %v2825_v26, %v974_v58 }
 0x1f0   : > { %v859_v39 = vpop.f32.mrb[0].mxu0  ;;  %v994_v5 = vpack.c.bf16 %v983_v61, %v983_v61 }
 0x1f1   : > { %v860_v42 = vadd.f32 %v859_v39, %v774_v33  ;;  %v861_v44 = vpop.f32.mrb[1].mxu0  ;;  %v992_v6 = vpack.c.bf16 %v975_v62, %v975_v62 }
 0x1f2   : > { %v4153_v49 = vadd.f32 %v861_v44, %v778_v36  ;;  %v863_v51 = vpop.f32.mrb[2].mxu0 }
 0x1f3   : > { %v995_v54 = vpack.c.bf16 %v860_v42, %v860_v42  ;;  %v1005_v55 = vcombine.high %v860_v42, %v860_v42  ;;  %v1012_v56 = vrot.slane %v860_v42, %v4148_v38  ;;  %v864_v57 = vpop.f32.mrb[3].mxu0 }
 0x1f4   : > { %v3318_v57 = vld [vmem:[#allocation11 + $0x8] sm:$0xff]  }
 0x1f5   : > { %v1019_v63 = vrot.slane %v1005_v55, %v4148_v38  ;;  %v1020_v1 = vcombine.high %v1012_v56, %v1012_v56  ;;  %v1028_v2 = vrot.slane %v1012_v56, %v4148_v38  ;;  %v4158_v3 = vadd.bf16 %v995_v54, %v987_v41  ;;  %v3317_v56 = vld [vmem:[#allocation11] sm:$0xff]  }
 0x1f6   : > { %v4163_v8 = vadd.bf16 %v995_v54, %v989_v47  ;;  %v4165_v10 = vadd.bf16 %v995_v54, %v988_v48  ;;  %v4169_v19 = vadd.bf16 %v995_v54, %v990_v53  ;;  %v4171_v21 = vadd.bf16 %v995_v54, %v991_v60  ;;  %3057 = vmatprep.subr.bf16.mxu0 %v3317_v56 }
 0x1f7   : > { %v1021_v11 = vcombine.high %v1019_v63, %v1019_v63  ;;  %v1062_v12 = vpack.c.bf16 %v1028_v2, %v1028_v2  ;;  %v1050_v15 = vcombine.high %v1028_v2, %v1028_v2  ;;  %v1042_v17 = vrot.slane %v1020_v1, %v4148_v38  ;;  %3058 = vmatpush3.bf16.msra.mxu0 %v3317_v56 }
 0x1f8   : > { %v1035_v18 = vrot.slane %v1019_v63, %v4148_v38  ;;  %v4173_v22 = vadd.bf16 %v995_v54, %v992_v6  ;;  %v4176_v32 = vadd.bf16 %v995_v54, %v993_v59  ;;  %v1003_v46 = vadd.bf16 %v995_v54, %v994_v5  ;;  %3059 = vmatprep.subr.bf16.mxu0 %v3318_v57  ;;  %v986_v59 = vld [vmem:[%s4062_s25] sm:$0x1] }
 0x1f9   : > { %v1071_v23 = vpack.i.b16 %v1062_v12, %v1062_v12  ;;  %v1064_v24 = vpack.c.bf16 %v1050_v15, %v1050_v15  ;;  %v1063_v26 = vpack.c.bf16 %v1042_v17, %v1042_v17  ;;  %v1052_v27 = vcombine.high %v1042_v17, %v1042_v17 }
 0x1fa   : > { %v1066_v28 = vpack.c.bf16 %v1035_v18, %v1035_v18  ;;  %v1049_v30 = vrot.slane %v1021_v11, %v4148_v38  ;;  %v1051_v31 = vcombine.high %v1035_v18, %v1035_v18  ;;  %v1166_v60 = vpack.c.bf16 %v986_v59, %v986_v59 }
 0x1fb   : > { %v1076_v33 = vrot.slane %v1071_v23, %v4138_v25  ;;  %v1085_v34 = vpack.i.b16 %v1064_v24, %v1064_v24  ;;  %v1078_v35 = vpack.i.b16 %v1063_v26, %v1063_v26  ;;  %v1065_v36 = vpack.c.bf16 %v1052_v27, %v1052_v27  ;;  %3060 = vmatpush3.bf16.msra.mxu0 %v3318_v57 }
 0x1fc   : > { %v1067_v39 = vpack.c.bf16 %v1049_v30, %v1049_v30  ;;  %v1053_v42 = vcombine.high %v1049_v30, %v1049_v30  ;;  %v1099_v44 = vpack.i.b16 %v1066_v28, %v1066_v28  ;;  %v1068_v45 = vpack.c.bf16 %v1051_v31, %v1051_v31 }
 0x1fd   : > { %1134 = vrot.lane.b32.xlu0 %v1076_v33, %s3662_s12  ;;  %v1090_v40 = vrot.slane %v1085_v34, %v4138_v25  ;;  %v1092_v41 = vpack.i.b16 %v1065_v36, %v1065_v36  ;;  %v1083_v43 = vrot.slane %v1078_v35, %v4138_v25  ;;  %v1168_v61 = vpack.i.b16 %v1166_v60, %v1166_v60 }
 0x1fe   : > { %v1106_v48 = vpack.i.b16 %v1067_v39, %v1067_v39  ;;  %v1069_v50 = vpack.c.bf16 %v1053_v42, %v1053_v42  ;;  %v1104_v51 = vrot.slane %v1099_v44, %v4138_v25  ;;  %v1113_v52 = vpack.i.b16 %v1068_v45, %v1068_v45  ;;  %v3319_v45 = vld [vmem:[#allocation11 + $0x10] sm:$0xff]  }
 0x1ff   : > { %1138 = vrot.lane.b32.xlu1 %v1090_v40, %s3662_s12  ;;  %v1097_v47 = vrot.slane %v1092_v41, %v4138_v25  ;;  %v1173_v63 = vrot.slane %v1168_v61, %v4138_v25  ;;  %3061 = vmatprep.subr.bf16.mxu0 %v3319_v45 }
 0x200   : > { %v1111_v53 = vrot.slane %v1106_v48, %v4138_v25  ;;  %v1120_v55 = vpack.i.b16 %v1069_v50, %v1069_v50  ;;  %v1118_v54 = vrot.slane %v1113_v52, %v4138_v25  ;;  %3062 = vmatpush3.bf16.msra.mxu0 %v3319_v45 }
 0x201   : > { %1136 = vrot.lane.b32.xlu0 %v1083_v43, %s3662_s12 }
 0x202   : > { %v1125_v58 = vrot.slane %v1120_v55, %v4138_v25 }
 0x203   : > { %1140 = vrot.lane.b32.xlu1 %v1097_v47, %s3662_s12  ;;  %v3320_v47 = vld [vmem:[#allocation11 + $0x18] sm:$0xff]  }
 0x204   : > { %3063 = vmatprep.subr.bf16.mxu0 %v3320_v47 }
 0x205   : > { %1142 = vrot.lane.b32.xlu0 %v1104_v51, %s3662_s12  ;;  %3064 = vmatpush3.bf16.msra.mxu0 %v3320_v47 }
 0x207   : > { %1144 = vrot.lane.b32.xlu1 %v1111_v53, %s3662_s12 }
 0x209   : > { %1146 = vrot.lane.b32.xlu0 %v1118_v54, %s3662_s12 }
 0x20b   : > { %1148 = vrot.lane.b32.xlu1 %v1125_v58, %s3662_s12 }
 0x26f   : > { %v1135_v62 = vpop.permute.xlu0 %1134 }
 0x270   : > { %v1158_v1 = vadd.bf16 %v1135_v62, %v4158_v3 }
 0x271   : > { %v1139_v2 = vpop.permute.xlu1 %1138 }
 0x272   : > { %v1160_v4 = vadd.bf16 %v1139_v2, %v4163_v8  ;;  %v1174_v6 = vadd.bf16 %v1173_v63, %v1158_v1 }
 0x273   : > { %v1137_v5 = vpop.permute.xlu0 %1136 }
 0x274   : > { %v1159_v11 = vadd.bf16 %v1137_v5, %v4165_v10  ;;  %v1176_v12 = vadd.bf16 %v1173_v63, %v1160_v4  ;;  %v1182_v24 = vmax.bf16 %v3660_v0, %v1174_v6 }
 0x275   : > { %v1141_v15 = vpop.permute.xlu1 %1140 }
 0x276   : > { %v1175_v17 = vadd.bf16 %v1173_v63, %v1159_v11  ;;  %v1161_v18 = vadd.bf16 %v1141_v15, %v4169_v19  ;;  %v1184_v28 = vmax.bf16 %v3660_v0, %v1176_v12 }
 0x277   : > { %v1143_v23 = vpop.permute.xlu0 %1142 }
 0x278   : > { %v1183_v26 = vmax.bf16 %v3660_v0, %v1175_v17  ;;  %v1177_v27 = vadd.bf16 %v1173_v63, %v1161_v18  ;;  %v1162_v3 = vadd.bf16 %v1143_v23, %v4171_v21 }
 0x279   : > { %v1145_v8 = vpop.permute.xlu1 %1144 }
 0x27a   : > { %v2837_v30 = vcombine.low %v1182_v24, %v1183_v26  ;;  %v1185_v31 = vmax.bf16 %v3660_v0, %v1177_v27  ;;  %v1178_v10 = vadd.bf16 %v1173_v63, %v1162_v3  ;;  %v1163_v33 = vadd.bf16 %v1145_v8, %v4173_v22  ;;  %v3321_v27 = vld [vmem:[#allocation13] sm:$0xff]   ;;  %v3323_v8 = vld [vmem:[#allocation13 + $0x10] sm:$0xff]  }
 0x27b   : > { %v1147_v34 = vpop.permute.xlu0 %1146  ;;  %v3663_v3 = vmov 0.0  }
 0x27c   : > { %v2838_v35 = vcombine.low %v1184_v28, %v1185_v31  ;;  %v1179_v19 = vadd.bf16 %v1173_v63, %v1163_v33  ;;  %v1164_v36 = vadd.bf16 %v1147_v34, %v4176_v32  ;;  %3049 = vmatprep.mubr.msk.bf16.mxu1 %vm821_vm1, %v2837_v30  ;;  %v1186_v39 = vmax.bf16 %v3660_v0, %v1178_v10  ;;  %v3322_v28 = vld [vmem:[#allocation13 + $0x8] sm:$0xff]   ;;  %v3324_v31 = vld [vmem:[#allocation13 + $0x18] sm:$0xff]  }
 0x27d   : > { %v1149_v37 = vpop.permute.xlu1 %1148  ;;  %3073 = vmatprep.subr.bf16.mxu1 %v3663_v3  ;;  %3085 = vmatprep.subr.bf16.mxu0 %v3663_v3  ;;  %v3325_v30 = vld [vmem:[%s4525_s13] sm:$0xff]   ;;  %v3326_v10 = vld [vmem:[%s4525_s13 + $0x8] sm:$0xff]  }
 0x27e   : > { %v1187_v21 = vmax.bf16 %v3660_v0, %v1179_v19  ;;  %v1180_v40 = vadd.bf16 %v1173_v63, %v1164_v36  ;;  %v1165_v41 = vadd.bf16 %v1149_v37, %v1003_v46  ;;  %3050 = vmatmul.mubr.msk.bf16.vlgmr.msra.gmra.mrb[8].mxu1 %vm821_vm1, %v2838_v35  ;;  %v2836_v46 = vld [vmem:[#allocation10] ss:$0 sm:$0xff]  ;;  %v2849_v36 = vld [vmem:[%s4522_s10] ss:$0 sm:$0xff] }
 0x27f   : > { %3074 = vmatpush3.bf16.msra.mxu1 %v3321_v27  ;;  %v3332_v27 = vld [vmem:[%s4593_s19 + $0x44] ss:$8 sps:$4 sm:$0xff]  }
 0x280   : > { %v2839_v42 = vcombine.low %v1186_v39, %v1187_v21  ;;  %v1181_v43 = vadd.bf16 %v1173_v63, %v1165_v41  ;;  %v1188_v22 = vmax.bf16 %v3660_v0, %v1180_v40  ;;  %3075 = vmatprep.subr.bf16.mxu1 %v3663_v3 }
 0x282   : > { %v1189_v44 = vmax.bf16 %v3660_v0, %v1181_v43  ;;  %3053 = vmatprep.mubr.msk.bf16.mxu1 %vm821_vm1, %v2839_v42 }
 0x283   : > { %3076 = vmatpush3.bf16.msra.mxu1 %v3322_v28  ;;  %v3333_v28 = vld [vmem:[#allocation8 + $0x18] sm:$0xff]  }
 0x284   : > { %v2840_v32 = vcombine.low %v1188_v22, %v1189_v44  ;;  %3077 = vmatprep.subr.bf16.mxu1 %v3663_v3 }
 0x286   : > { %3054 = vmatmul.mubr.msk.bf16.gmra.mrb[12].mxu1 %vm821_vm1, %v2840_v32 }
 0x287   : > { %3081 = vmatprep.mubr.msk.bf16.mxu1 %vm3664_vm2, %v3663_v3  ;;  %3078 = vmatpush3.bf16.msra.mxu1 %v3323_v8  ;;  %v3339_v8 = vld [vmem:[%s4593_s19 + $0x64] ss:$8 sps:$4 sm:$0xff]  }
 0x288   : > { %3079 = vmatprep.subr.bf16.mxu1 %v3663_v3 }
 0x28b   : > { %3080 = vmatpush3.bf16.msra.mxu1 %v3324_v31  ;;  %v3342_v31 = vld [vmem:[%s4593_s19 + $0x74] ss:$8 sps:$4 sm:$0xff]  }
 0x28c   : > { %1708 = vmatprep.subr.bf16.mxu1 %v3332_v27 }
 0x351   : > { %v3051_v48 = vpop.f32.mrb[8].mxu1 }
 0x352   : > { %v1304_v50 = vadd.f32 %v3051_v48, %v2836_v46  ;;  %v1295_v51 = vpop.f32.mrb[9].mxu1 }
 0x353   : > { %v1296_v52 = vadd.f32 %v2836_v46, %v1295_v51  ;;  %v3052_v53 = vpop.f32.mrb[10].mxu1 }
 0x354   : > { %v1307_v55 = vadd.f32 %v3052_v53, %v2836_v46  ;;  %v1298_v56 = vpop.f32.mrb[11].mxu1  ;;  %v1328_v54 = vmax.f32 %v1304_v50, 0.0 }
 0x355   : > { %v1299_v57 = vadd.f32 %v2836_v46, %v1298_v56  ;;  %v1326_v59 = vmax.f32 %v1296_v52, 0.0 }
 0x356   : > { %v1329_v58 = vmax.f32 %v1307_v55, 0.0 }
 0x357   : > { %v1327_v60 = vmax.f32 %v1299_v57, 0.0 }
 0x358   : > { %v1335_v61 = vpack.c.bf16 %v1329_v58, %v1328_v54 }
 0x359   : > { %v1334_v62 = vpack.c.bf16 %v1327_v60, %v1326_v59  ;;  %v3055_v63 = vpop.f32.mrb[12].mxu1 }
 0x35a   : > { %v1320_v1 = vadd.f32 %v3055_v63, %v2836_v46  ;;  %v1311_v2 = vpop.f32.mrb[13].mxu1 }
 0x35b   : > { %v1312_v4 = vadd.f32 %v2836_v46, %v1311_v2  ;;  %v3056_v5 = vpop.f32.mrb[14].mxu1  ;;  %3065 = vmatprep.mubr.msk.bf16.mxu0 %vm821_vm1, %v1334_v62  ;;  %v3328_v2 = vld [vmem:[%s4525_s13 + $0x18] sm:$0xff]  }
 0x35c   : > { %v1323_v6 = vadd.f32 %v3056_v5, %v2836_v46  ;;  %v1314_v11 = vpop.f32.mrb[15].mxu1  ;;  %3066 = vmatmul.mubr.msk.bf16.vlgmr.msra.gmra.mrb[4].mxu0 %vm821_vm1, %v1335_v61  ;;  %v1332_v15 = vmax.f32 %v1320_v1, 0.0  ;;  %v3327_v1 = vld [vmem:[%s4525_s13 + $0x10] sm:$0xff]  }
 0x35d   : > { %v1315_v12 = vadd.f32 %v2836_v46, %v1314_v11  ;;  %v1330_v18 = vmax.f32 %v1312_v4, 0.0  ;;  %3086 = vmatpush3.bf16.msra.mxu0 %v3325_v30  ;;  %v2858_v4 = vld [vmem:[%s4595_s17] ss:$0 sm:$0xff] }
 0x35e   : > { %v1333_v17 = vmax.f32 %v1323_v6, 0.0  ;;  %3087 = vmatprep.subr.bf16.mxu0 %v3663_v3  ;;  %v3337_v30 = vld [vmem:[%s4593_s19 + $0x60] ss:$8 sps:$4 sm:$0xff]  }
 0x35f   : > { %v1331_v23 = vmax.f32 %v1315_v12, 0.0 }
 0x360   : > { %v1337_v24 = vpack.c.bf16 %v1333_v17, %v1332_v15 }
 0x361   : > { %v1336_v26 = vpack.c.bf16 %v1331_v23, %v1330_v18  ;;  %3088 = vmatpush3.bf16.msra.mxu0 %v3326_v10  ;;  %v3340_v10 = vld [vmem:[%s4593_s19 + $0x70] ss:$8 sps:$4 sm:$0xff]  }
 0x362   : > { %3089 = vmatprep.subr.bf16.mxu0 %v3663_v3 }
 0x363   : > { %3069 = vmatprep.mubr.msk.bf16.mxu0 %vm821_vm1, %v1336_v26  ;;  %v3330_v26 = vld [vmem:[%s4593_s19 + $0x40] ss:$8 sps:$4 sm:$0xff]  }
 0x364   : > { %3070 = vmatmul.mubr.msk.bf16.gmra.mrb[8].mxu0 %vm821_vm1, %v1337_v24  ;;  %v3329_v24 = vld [vmem:[#allocation8 + $0x10] sm:$0xff]  }
 0x365   : > { %3093 = vmatprep.mubr.msk.bf16.mxu0 %vm3664_vm2, %v3663_v3  ;;  %3090 = vmatpush3.bf16.msra.mxu0 %v3327_v1 }
 0x366   : > { %3091 = vmatprep.subr.bf16.mxu0 %v3663_v3 }
 0x369   : > { %3092 = vmatpush3.bf16.msra.mxu0 %v3328_v2 }
 0x36a   : > { %3097 = vmatprep.subr.bf16.mxu0 %v3329_v24 }
 0x42f   : > { %v3067_v33 = vpop.f32.mrb[4].mxu0 }
 0x430   : > { %v1423_v34 = vpop.f32.mrb[5].mxu0  ;;  %v1432_v37 = vadd.f32 %v3067_v33, %v2849_v36  ;;  %v2864_v33 = vld [vmem:[%s4596_s11] ss:$0 sm:$0xff] }
 0x431   : > { %v3068_v35 = vpop.f32.mrb[6].mxu0  ;;  %v1424_v39 = vadd.f32 %v2849_v36, %v1423_v34 }
 0x432   : > { %v1426_v19 = vpop.f32.mrb[7].mxu0  ;;  %v1435_v40 = vadd.f32 %v3068_v35, %v2849_v36  ;;  %v1456_v32 = vsel %vm821_vm1, %v1432_v37, -inf }
 0x433   : > { %v1427_v43 = vadd.f32 %v2849_v36, %v1426_v19  ;;  %v1454_v48 = vsel %vm821_vm1, %v1424_v39, -inf }
 0x434   : > { %v1457_v53 = vsel %vm821_vm1, %v1435_v40, -inf }
 0x435   : > { %v1455_v57 = vsel %vm821_vm1, %v1427_v43, -inf }
 0x437   : > { %v3071_v21 = vpop.f32.mrb[8].mxu0 }
 0x438   : > { %v1448_v41 = vadd.f32 %v3071_v21, %v2849_v36  ;;  %v1439_v42 = vpop.f32.mrb[9].mxu0 }
 0x439   : > { %v1440_v22 = vadd.f32 %v2849_v36, %v1439_v42  ;;  %v3072_v44 = vpop.f32.mrb[10].mxu0 }
 0x43a   : > { %v1462_v45 = vsel %vm821_vm1, %v1448_v41, -inf  ;;  %v1451_v47 = vadd.f32 %v3072_v44, %v2849_v36  ;;  %v1442_v46 = vpop.f32.mrb[11].mxu0 }
 0x43b   : > { %v1463_v50 = vmax.f32 %v1456_v32, %v1462_v45  ;;  %v1458_v51 = vsel %vm821_vm1, %v1440_v22, -inf  ;;  %v1443_v52 = vadd.f32 %v2849_v36, %v1442_v46  ;;  %v3343_v32 = vld [vmem:[%s4519_s7 + $0x20] sm:$0xff]  }
 0x43c   : > { %v1459_v55 = vmax.f32 %v1454_v48, %v1458_v51  ;;  %v1464_v56 = vsel %vm821_vm1, %v1451_v47, -inf  ;;  %v2888_v45 = vld [vmem:[%s4518_s6 + $0x1] ss:$0 sm:$0xff]  ;;  %v4308_v47 = vld [vmem:[#allocation7 + $0x2] sm:$0x3] }
 0x43d   : > { %v1465_v54 = vmax.f32 %v1457_v53, %v1464_v56  ;;  %v1460_v58 = vsel %vm821_vm1, %v1443_v52, -inf }
 0x43e   : > { %v1461_v59 = vmax.f32 %v1455_v57, %v1460_v58 }
 0x43f   : > { %v1467_v60 = vmax.f32 %v1463_v50, %v1465_v54 }
 0x440   : > { %v1466_v61 = vmax.f32 %v1459_v55, %v1461_v59 }
 0x442   : > { %v1468_v62 = vmax.f32 %v1466_v61, %v1467_v60 }
 0x444   : > { %v1469_v63 = vpack.c.bf16 %v1468_v62, %v1468_v62 }
 0x446   : > { %3082 = vmatmul.mubr.msk.bf16.vlgmr.msra.gmra.mrb[16].mxu1 %vm821_vm1, %v1469_v63 }
 0x447   : > { %1740 = vmatprep.mubr.bf16.mxu1 %v3660_v0  ;;  %1709 = vmatpush1.bf16.msra.mxu1 %v3330_v26 }
 0x519   : > { %v1546_v5 = vpop.f32.mrb[16].mxu1 }
 0x51a   : > { %v1547_v6 = vadd.f32 %v2858_v4, %v1546_v5  ;;  %v3083_v11 = vpop.f32.mrb[17].mxu1 }
 0x51b   : > { %v1549_v12 = vpop.f32.mrb[18].mxu1 }
 0x51c   : > { %v1552_v15 = vadd.f32 %v1547_v6, %v4153_v49  ;;  %v3084_v17 = vpop.f32.mrb[19].mxu1  ;;  %v3336_v49 = vld [vmem:[%s4593_s19 + $0x54] ss:$8 sps:$4 sm:$0xff]  }
 0x51d   : > { %1710 = vmatprep.subr.bf16.mxu1 %v3336_v49  ;;  %v3344_v17 = vld [vmem:[%s4519_s7 + $0x28] sm:$0xff]  }
 0x51e   : > { %v1553_v18 = vmax.f32 %v1552_v15, 0.0 }
 0x520   : > { %v1554_v23 = vpack.c.bf16 %v1553_v18, %v1553_v18 }
 0x522   : > { %3094 = vmatmul.mubr.msk.bf16.vlgmr.msra.gmra.mrb[12].mxu0 %vm821_vm1, %v1554_v23 }
 0x523   : > { %3101 = vmatprep.mubr.msk.bf16.mxu0 %vm758_vm0, %v4098_v7  ;;  %3098 = vmatpush3.bf16.msra.mxu0 %v3329_v24  ;;  %v3334_v7 = vld [vmem:[%s4593_s19 + $0x50] ss:$8 sps:$4 sm:$0xff]  }
 0x524   : > { %3099 = vmatprep.subr.bf16.mxu0 %v3333_v28  ;;  %1711 = vmatpush1.bf16.msra.mxu1 %v3334_v7 }
 0x525   : > { %1712 = vmatprep.subr.bf16.mxu1 %v3339_v8 }
 0x527   : > { %3100 = vmatpush3.bf16.msra.mxu0 %v3333_v28 }
 0x528   : > { %1713 = vmatpush1.bf16.msra.mxu1 %v3337_v30  ;;  %3109 = vmatprep.subr.bf16.mxu0 %v3343_v32 }
 0x529   : > { %1714 = vmatprep.subr.bf16.mxu1 %v3342_v31 }
 0x52a   : > { %3102 = vmatmul.mubr.msk.bf16.vlgmr.msra.gmra.mrb[16].mxu0 %vm758_vm0, %v4105_v9 }
 0x52b   : > { %3105 = vmatprep.mubr.msk.bf16.mxu0 %vm758_vm0, %v4116_v13  ;;  %3110 = vmatpush3.bf16.msra.mxu0 %v3343_v32 }
 0x52c   : > { %1715 = vmatpush1.bf16.msra.mxu1 %v3340_v10  ;;  %3111 = vmatprep.subr.bf16.mxu0 %v3344_v17 }
 0x52f   : > { %3112 = vmatpush3.bf16.msra.mxu0 %v3344_v17 }
 0x532   : > { %3106 = vmatmul.mubr.msk.bf16.gmra.mrb[20].mxu0 %vm758_vm0, %v4127_v16 }
 0x5f5   : > { %v1631_v34 = vpop.f32.mrb[12].mxu0 }
 0x5f6   : > { %v1632_v35 = vadd.f32 %v2864_v33, %v1631_v34  ;;  %v3095_v9 = vpop.f32.mrb[13].mxu0  ;;  %v3345_v34 = vld [vmem:[%s4519_s7 + $0x30] sm:$0xff]  }
 0x5f7   : > { %v1634_v19 = vpop.f32.mrb[14].mxu0  ;;  %3113 = vmatprep.subr.bf16.mxu0 %v3345_v34 }
 0x5f8   : > { %1638 = vrot.lane.b32.xlu0 %v1632_v35, %s3665_s23  ;;  %v3096_v36 = vpop.f32.mrb[15].mxu0  ;;  %3114 = vmatpush3.bf16.msra.mxu0 %v3345_v34  ;;  %s3666_s23 = smov [#allocation14]  }
 0x5f9   : > { %s3567_s22 = sshll.u32 %s3666_s23, 4  ;;  %s3568_s22 = int_to_ptr.vmem [resolvable:$false] %s3567_s22 }
 0x5fa   : > { %p3570_p5 = scmp.lt.s32.totalorder %s4470_s4, %s3568_s22 }
 0x5fd   : > { %v3103_v37 = vpop.f32.mrb[16].mxu0 }
 0x5fe   : > { %v1808_v39 = vpop.f32.mrb[17].mxu0  ;;  %v1817_v48 = vadd.f32 %v3103_v37, %v2888_v45 }
 0x5ff   : > { %v3104_v21 = vpop.f32.mrb[18].mxu0  ;;  %v1809_v46 = vadd.f32 %v2888_v45, %v1808_v39 }
 0x600   : > { %v1811_v13 = vpop.f32.mrb[19].mxu0  ;;  %v1820_v50 = vadd.f32 %v3104_v21, %v2888_v45  ;;  %v1843_v60 = vpack.c.bf16 %v1817_v48, %v1817_v48 }
 0x601   : > { %v1812_v51 = vadd.f32 %v2888_v45, %v1811_v13  ;;  %v1841_v54 = vpack.c.bf16 %v1809_v46, %v1809_v46 }
 0x602   : > { %v1844_v61 = vpack.c.bf16 %v1820_v50, %v1820_v50 }
 0x603   : > { %v1842_v62 = vpack.c.bf16 %v1812_v51, %v1812_v51 }
 0x605   : > { %v3107_v40 = vpop.f32.mrb[20].mxu0 }
 0x606   : > { %v1824_v41 = vpop.f32.mrb[21].mxu0  ;;  %v1833_v53 = vadd.f32 %v3107_v40, %v2888_v45 }
 0x607   : > { %v3108_v42 = vpop.f32.mrb[22].mxu0  ;;  %v1825_v52 = vadd.f32 %v2888_v45, %v1824_v41 }
 0x608   : > { %v1827_v44 = vpop.f32.mrb[23].mxu0  ;;  %v1836_v55 = vadd.f32 %v3108_v42, %v2888_v45  ;;  %v1847_v11 = vpack.c.bf16 %v1833_v53, %v1833_v53 }
 0x609   : > { %v1828_v57 = vadd.f32 %v2888_v45, %v1827_v44  ;;  %v1845_v63 = vpack.c.bf16 %v1825_v52, %v1825_v52  ;;  %v3346_v44 = vld [vmem:[%s4519_s7 + $0x38] sm:$0xff]  }
 0x60a   : > { %v1848_v12 = vpack.c.bf16 %v1836_v55, %v1836_v55  ;;  %3115 = vmatprep.subr.bf16.mxu0 %v3346_v44 }
 0x60b   : > { %v1846_v15 = vpack.c.bf16 %v1828_v57, %v1828_v57  ;;  %3116 = vmatpush3.bf16.msra.mxu0 %v3346_v44 }
 0x60c   : > { %3141 = vmatprep.subr.bf16.mxu0 %v3663_v3 }
 0x66a   : > { %v1639_v43 = vpop.permute.xlu0 %1638 }
 0x66b   : > { %v1641_v16 = vsel %vm758_vm0, %v4119_v14, %v1639_v43  ;;  %v1658_v14 = vrot.slane %v4308_v47, %v4138_v25 }
 0x66c   : > { %v1642_v22 = vpack.c.bf16 %v1641_v16, %v1641_v16 }
 0x66e   : > { %2886 = vmatmul.mubr.msk.bf16.vlgmr.msra.gmra.mrb[20].mxu1 %vm821_vm1, %v1642_v22 }
 0x741   : > { %v1742_v56 = vpop.f32.mrb[20].mxu1 }
 0x742   : > { %v1743_v58 = vadd.f32 %v1742_v56, %v1658_v14  ;;  %v4312_v59 = vpop.f32.mrb[21].mxu1 }
 0x743   : > { %v1746_v1 = vpop.f32.mrb[22].mxu1 }
 0x744   : > { %v1849_v2 = vpack.c.bf16 %v1743_v58, %v1743_v58  ;;  %v1859_v4 = vcombine.high %v1743_v58, %v1743_v58  ;;  %v1866_v5 = vrot.slane %v1743_v58, %v4148_v38  ;;  %v1747_v6 = vpop.f32.mrb[23].mxu1  ;;  %v3347_v58 = vld [vmem:[#allocation11 + $0x20] sm:$0xff]  }
 0x745   : > { %3125 = vmatprep.subr.bf16.mxu1 %v3347_v58 }
 0x746   : > { %v1873_v18 = vrot.slane %v1859_v4, %v4148_v38  ;;  %v1874_v23 = vcombine.high %v1866_v5, %v1866_v5  ;;  %v1882_v24 = vrot.slane %v1866_v5, %v4148_v38  ;;  %v4320_v26 = vadd.bf16 %v1849_v2, %v1841_v54  ;;  %3126 = vmatpush3.bf16.msra.mxu1 %v3347_v58 }
 0x747   : > { %v4322_v27 = vadd.bf16 %v1849_v2, %v1842_v62  ;;  %v4324_v28 = vadd.bf16 %v1849_v2, %v1843_v60  ;;  %v4326_v49 = vadd.bf16 %v1849_v2, %v1844_v61  ;;  %v4328_v7 = vadd.bf16 %v1849_v2, %v1845_v63  ;;  %v3348_v60 = vld [vmem:[#allocation11 + $0x28] sm:$0xff]   ;;  %v2895_v63 = vld [vmem:[%s4062_s25 + $0x1] sm:$0x1]  ;;  %s4599_s25 = sld [smem:[#allocation33_spill]] }
 0x748   : > { %v1875_v8 = vcombine.high %v1873_v18, %v1873_v18  ;;  %v1916_v30 = vpack.c.bf16 %v1882_v24, %v1882_v24  ;;  %v1896_v31 = vrot.slane %v1874_v23, %v4148_v38  ;;  %v1904_v10 = vcombine.high %v1882_v24, %v1882_v24  ;;  %3127 = vmatprep.subr.bf16.mxu1 %v3348_v60 }
 0x749   : > { %v1889_v33 = vrot.slane %v1873_v18, %v4148_v38  ;;  %v4335_v35 = vadd.bf16 %v1849_v2, %v1846_v15  ;;  %v4337_v9 = vadd.bf16 %v1849_v2, %v1847_v11  ;;  %v4339_v19 = vadd.bf16 %v1849_v2, %v1848_v12 }
 0x74a   : > { %v1925_v36 = vpack.i.b16 %v1916_v30, %v1916_v30  ;;  %v1917_v37 = vpack.c.bf16 %v1896_v31, %v1896_v31  ;;  %v1918_v39 = vpack.c.bf16 %v1904_v10, %v1904_v10  ;;  %v1906_v21 = vcombine.high %v1896_v31, %v1896_v31  ;;  %3128 = vmatpush3.bf16.msra.mxu1 %v3348_v60 }
 0x74b   : > { %v1920_v13 = vpack.c.bf16 %v1889_v33, %v1889_v33  ;;  %v1903_v40 = vrot.slane %v1875_v8, %v4148_v38  ;;  %v1905_v41 = vcombine.high %v1889_v33, %v1889_v33  ;;  %v2020_v1 = vpack.c.bf16 %v2895_v63, %v2895_v63 }
 0x74c   : > { %v1930_v42 = vrot.slane %v1925_v36, %v4138_v25  ;;  %v1932_v43 = vpack.i.b16 %v1917_v37, %v1917_v37  ;;  %v1939_v16 = vpack.i.b16 %v1918_v39, %v1918_v39  ;;  %v1919_v22 = vpack.c.bf16 %v1906_v21, %v1906_v21 }
 0x74d   : > { %v1921_v46 = vpack.c.bf16 %v1903_v40, %v1903_v40  ;;  %v1907_v14 = vcombine.high %v1903_v40, %v1903_v40  ;;  %v1953_v48 = vpack.i.b16 %v1920_v13, %v1920_v13  ;;  %v1922_v50 = vpack.c.bf16 %v1905_v41, %v1905_v41 }
 0x74e   : > { %1988 = vrot.lane.b32.xlu1 %v1930_v42, %s3662_s12  ;;  %v1937_v32 = vrot.slane %v1932_v43, %v4138_v25  ;;  %v1946_v45 = vpack.i.b16 %v1919_v22, %v1919_v22  ;;  %v1944_v38 = vrot.slane %v1939_v16, %v4138_v25  ;;  %v2022_v2 = vpack.i.b16 %v2020_v1, %v2020_v1 }
 0x74f   : > { %v1960_v52 = vpack.i.b16 %v1921_v46, %v1921_v46  ;;  %v1923_v53 = vpack.c.bf16 %v1907_v14, %v1907_v14  ;;  %v1958_v55 = vrot.slane %v1953_v48, %v4138_v25  ;;  %v1967_v56 = vpack.i.b16 %v1922_v50, %v1922_v50  ;;  %v3350_v46 = vld [vmem:[#allocation11 + $0x38] sm:$0xff]  }
 0x750   : > { %1990 = vrot.lane.b32.xlu0 %v1937_v32, %s3662_s12  ;;  %v1951_v51 = vrot.slane %v1946_v45, %v4138_v25  ;;  %v2027_v4 = vrot.slane %v2022_v2, %v4138_v25 }
 0x751   : > { %v1965_v57 = vrot.slane %v1960_v52, %v4138_v25  ;;  %v1974_v54 = vpack.i.b16 %v1923_v53, %v1923_v53  ;;  %v1972_v61 = vrot.slane %v1967_v56, %v4138_v25 }
 0x752   : > { %1992 = vrot.lane.b32.xlu1 %v1944_v38, %s3662_s12 }
 0x753   : > { %v1979_v62 = vrot.slane %v1974_v54, %v4138_v25 }
 0x754   : > { %1994 = vrot.lane.b32.xlu0 %v1951_v51, %s3662_s12 }
 0x756   : > { %1996 = vrot.lane.b32.xlu1 %v1958_v55, %s3662_s12 }
 0x758   : > { %1998 = vrot.lane.b32.xlu0 %v1965_v57, %s3662_s12 }
 0x75a   : > { %2000 = vrot.lane.b32.xlu1 %v1972_v61, %s3662_s12 }
 0x75c   : > { %2002 = vrot.lane.b32.xlu0 %v1979_v62, %s3662_s12  ;;  %s4597_s12 = sld [smem:[#allocation32_spill]] }
 0x762   : > { %v3359_v20 = vld [vmem:[%s4597_s12] sm:$0xff]  }
 0x7c0   : > { %v1989_v5 = vpop.permute.xlu1 %1988 }
 0x7c1   : > { %v2012_v6 = vadd.bf16 %v1989_v5, %v4320_v26 }
 0x7c2   : > { %v1991_v11 = vpop.permute.xlu0 %1990 }
 0x7c3   : > { %v2028_v12 = vadd.bf16 %v2027_v4, %v2012_v6  ;;  %v2013_v15 = vadd.bf16 %v1991_v11, %v4322_v27 }
 0x7c4   : > { %v1993_v17 = vpop.permute.xlu1 %1992 }
 0x7c5   : > { %v2029_v18 = vadd.bf16 %v2027_v4, %v2013_v15  ;;  %v2014_v23 = vadd.bf16 %v1993_v17, %v4324_v28  ;;  %v2036_v8 = vmax.bf16 %v3660_v0, %v2028_v12 }
 0x7c6   : > { %v1995_v24 = vpop.permute.xlu0 %1994 }
 0x7c7   : > { %v2037_v30 = vmax.bf16 %v3660_v0, %v2029_v18  ;;  %v2030_v31 = vadd.bf16 %v2027_v4, %v2014_v23  ;;  %v2015_v10 = vadd.bf16 %v1995_v24, %v4326_v49  ;;  %v3351_v24 = vld [vmem:[#allocation13 + $0x20] sm:$0xff]  }
 0x7c8   : > { %v1997_v25 = vpop.permute.xlu1 %1996 }
 0x7c9   : > { %v2905_v33 = vcombine.low %v2036_v8, %v2037_v30  ;;  %v2031_v34 = vadd.bf16 %v2027_v4, %v2015_v10  ;;  %v2016_v26 = vadd.bf16 %v1997_v25, %v4328_v7  ;;  %v2038_v27 = vmax.bf16 %v3660_v0, %v2030_v31  ;;  %v3352_v8 = vld [vmem:[#allocation13 + $0x28] sm:$0xff]   ;;  %v3353_v30 = vld [vmem:[#allocation13 + $0x30] sm:$0xff]   ;;  %v3354_v10 = vld [vmem:[#allocation13 + $0x38] sm:$0xff]  }
 0x7ca   : > { %v1999_v36 = vpop.permute.xlu0 %1998  ;;  %v3355_v31 = vld [vmem:[%s4525_s13 + $0x20] sm:$0xff]   ;;  %v3356_v25 = vld [vmem:[%s4525_s13 + $0x28] sm:$0xff]  }
 0x7cb   : > { %v2039_v37 = vmax.bf16 %v3660_v0, %v2031_v34  ;;  %v2032_v39 = vadd.bf16 %v2027_v4, %v2016_v26  ;;  %v2017_v28 = vadd.bf16 %v1999_v36, %v4335_v35  ;;  %3117 = vmatprep.mubr.msk.bf16.mxu0 %vm821_vm1, %v2905_v33 }
 0x7cc   : > { %v2001_v21 = vpop.permute.xlu1 %2000 }
 0x7cd   : > { %v2906_v13 = vcombine.low %v2038_v27, %v2039_v37  ;;  %v2033_v40 = vadd.bf16 %v2027_v4, %v2017_v28  ;;  %v2018_v49 = vadd.bf16 %v2001_v21, %v4337_v9  ;;  %v2040_v42 = vmax.bf16 %v3660_v0, %v2032_v39  ;;  %v3349_v9 = vld [vmem:[#allocation11 + $0x30] sm:$0xff]   ;;  %v2918_v27 = vld [vmem:[%s4522_s10 + $0x1] ss:$0 sm:$0xff] }
 0x7ce   : > { %v2003_v41 = vpop.permute.xlu0 %2002  ;;  %3129 = vmatprep.subr.bf16.mxu1 %v3349_v9 }
 0x7cf   : > { %v2041_v7 = vmax.bf16 %v3660_v0, %v2033_v40  ;;  %v2034_v43 = vadd.bf16 %v2027_v4, %v2018_v49  ;;  %v2019_v16 = vadd.bf16 %v2003_v41, %v4339_v19  ;;  %3118 = vmatmul.mubr.msk.bf16.vlgmr.msra.gmra.mrb[24].mxu0 %vm821_vm1, %v2906_v13  ;;  %3130 = vmatpush3.bf16.msra.mxu1 %v3349_v9  ;;  %v2904_v19 = vld [vmem:[#allocation10 + $0x1] ss:$0 sm:$0xff] }
 0x7d0   : > { %3131 = vmatprep.subr.bf16.mxu1 %v3350_v46  ;;  %3142 = vmatpush3.bf16.msra.mxu0 %v3351_v24 }
 0x7d1   : > { %v2907_v22 = vcombine.low %v2040_v42, %v2041_v7  ;;  %v2035_v44 = vadd.bf16 %v2027_v4, %v2019_v16  ;;  %v2042_v35 = vmax.bf16 %v3660_v0, %v2034_v43  ;;  %3143 = vmatprep.subr.bf16.mxu0 %v3663_v3 }
 0x7d3   : > { %v2043_v32 = vmax.bf16 %v3660_v0, %v2035_v44  ;;  %3121 = vmatprep.mubr.msk.bf16.mxu0 %vm821_vm1, %v2907_v22  ;;  %3132 = vmatpush3.bf16.msra.mxu1 %v3350_v46 }
 0x7d4   : > { %3153 = vmatprep.subr.bf16.mxu1 %v3663_v3  ;;  %3144 = vmatpush3.bf16.msra.mxu0 %v3352_v8 }
 0x7d5   : > { %v2908_v45 = vcombine.low %v2042_v35, %v2043_v32  ;;  %3145 = vmatprep.subr.bf16.mxu0 %v3663_v3 }
 0x7d7   : > { %3122 = vmatmul.mubr.msk.bf16.gmra.mrb[28].mxu0 %vm821_vm1, %v2908_v45 }
 0x7d8   : > { %3149 = vmatprep.mubr.msk.bf16.mxu0 %vm3664_vm2, %v3663_v3  ;;  %3146 = vmatpush3.bf16.msra.mxu0 %v3353_v30 }
 0x7d9   : > { %3147 = vmatprep.subr.bf16.mxu0 %v3663_v3 }
 0x7dc   : > { %3148 = vmatpush3.bf16.msra.mxu0 %v3354_v10 }
 0x7dd   : > { %3165 = vmatprep.subr.bf16.mxu0 %v3663_v3 }
 0x8a2   : > { %v3119_v14 = vpop.f32.mrb[24].mxu0 }
 0x8a3   : > { %v2160_v38 = vadd.f32 %v3119_v14, %v2904_v19  ;;  %v2151_v0 = vpop.f32.mrb[25].mxu0 }
 0x8a4   : > { %v2152_v48 = vadd.f32 %v2904_v19, %v2151_v0  ;;  %v3120_v50 = vpop.f32.mrb[26].mxu0 }
 0x8a5   : > { %v2163_v51 = vadd.f32 %v3120_v50, %v2904_v19  ;;  %v2154_v52 = vpop.f32.mrb[27].mxu0  ;;  %v2184_v55 = vmax.f32 %v2160_v38, 0.0 }
 0x8a6   : > { %v2155_v53 = vadd.f32 %v2904_v19, %v2154_v52  ;;  %v2182_v57 = vmax.f32 %v2152_v48, 0.0 }
 0x8a7   : > { %v2185_v56 = vmax.f32 %v2163_v51, 0.0 }
 0x8a8   : > { %v2183_v54 = vmax.f32 %v2155_v53, 0.0 }
 0x8a9   : > { %v2191_v58 = vpack.c.bf16 %v2185_v56, %v2184_v55  ;;  %v3357_v55 = vld [vmem:[%s4525_s13 + $0x30] sm:$0xff]   ;;  %v3358_v56 = vld [vmem:[%s4525_s13 + $0x38] sm:$0xff]  }
 0x8aa   : > { %v2190_v60 = vpack.c.bf16 %v2183_v54, %v2182_v57  ;;  %v3123_v61 = vpop.f32.mrb[28].mxu0  ;;  %v1662_v57 = vrot.slane %v4308_v47, %v777_v29  ;;  %v2928_v54 = vld [vmem:[%s4595_s17 + $0x1] ss:$0 sm:$0xff]  ;;  %v3360_v29 = vld [vmem:[%s4597_s12 + $0x8] sm:$0xff]  }
 0x8ab   : > { %v2176_v62 = vadd.f32 %v3123_v61, %v2904_v19  ;;  %v2167_v63 = vpop.f32.mrb[29].mxu0  ;;  %v3361_v47 = vld [vmem:[%s4598_s28] sm:$0xff]  }
 0x8ac   : > { %v2168_v1 = vadd.f32 %v2904_v19, %v2167_v63  ;;  %v3124_v2 = vpop.f32.mrb[30].mxu0  ;;  %3133 = vmatprep.mubr.msk.bf16.mxu1 %vm821_vm1, %v2190_v60  ;;  %v1745_v60 = vadd.f32 %v4312_v59, %v1662_v57  ;;  %v2943_v59 = vld [vmem:[%s4596_s11 + $0x1] ss:$0 sm:$0xff] }
 0x8ad   : > { %v2179_v4 = vadd.f32 %v3124_v2, %v2904_v19  ;;  %v2170_v5 = vpop.f32.mrb[31].mxu0  ;;  %3134 = vmatmul.mubr.msk.bf16.vlgmr.msra.gmra.mrb[24].mxu1 %vm821_vm1, %v2191_v58  ;;  %v2188_v11 = vmax.f32 %v2176_v62, 0.0 }
 0x8ae   : > { %v2171_v6 = vadd.f32 %v2904_v19, %v2170_v5  ;;  %v2186_v15 = vmax.f32 %v2168_v1, 0.0  ;;  %3154 = vmatpush3.bf16.msra.mxu1 %v3355_v31 }
 0x8af   : > { %v2189_v12 = vmax.f32 %v2179_v4, 0.0  ;;  %3155 = vmatprep.subr.bf16.mxu1 %v3663_v3 }
 0x8b0   : > { %v2187_v17 = vmax.f32 %v2171_v6, 0.0 }
 0x8b1   : > { %v2193_v18 = vpack.c.bf16 %v2189_v12, %v2188_v11 }
 0x8b2   : > { %v2192_v23 = vpack.c.bf16 %v2187_v17, %v2186_v15  ;;  %3156 = vmatpush3.bf16.msra.mxu1 %v3356_v25 }
 0x8b3   : > { %3157 = vmatprep.subr.bf16.mxu1 %v3663_v3 }
 0x8b4   : > { %3137 = vmatprep.mubr.msk.bf16.mxu1 %vm821_vm1, %v2192_v23 }
 0x8b5   : > { %3138 = vmatmul.mubr.msk.bf16.gmra.mrb[28].mxu1 %vm821_vm1, %v2193_v18 }
 0x8b6   : > { %3161 = vmatprep.mubr.msk.bf16.mxu1 %vm3664_vm2, %v3663_v3  ;;  %3158 = vmatpush3.bf16.msra.mxu1 %v3357_v55 }
 0x8b7   : > { %3159 = vmatprep.subr.bf16.mxu1 %v3663_v3 }
 0x8ba   : > { %3160 = vmatpush3.bf16.msra.mxu1 %v3358_v56 }
 0x8bb   : > { %3173 = vmatprep.subr.bf16.mxu1 %v3663_v3 }
 0x980   : > { %v3135_v33 = vpop.f32.mrb[24].mxu1 }
 0x981   : > { %v2281_v34 = vpop.f32.mrb[25].mxu1  ;;  %v2290_v37 = vadd.f32 %v3135_v33, %v2918_v27  ;;  %v3362_v33 = vld [vmem:[%s4598_s28 + $0x8] sm:$0xff]  }
 0x982   : > { %v3136_v26 = vpop.f32.mrb[26].mxu1  ;;  %v2282_v39 = vadd.f32 %v2918_v27, %v2281_v34  ;;  %v2513_v34 = vld [vmem:[%s4599_s25] sm:$0x1]  ;;  %s3563_s25 = scalar_lea.vmem %s4470_s4, 16 }
 0x983   : > { %v2284_v36 = vpop.f32.mrb[27].mxu1  ;;  %v2293_v21 = vadd.f32 %v3136_v26, %v2918_v27  ;;  %v2314_v7 = vsel %vm821_vm1, %v2290_v37, -inf  ;;  %p3564_p13 = scmp.ne.s32.totalorder %s4470_s4, %s3563_s25 }
 0x984   : > { %v2285_v49 = vadd.f32 %v2918_v27, %v2284_v36  ;;  %v2312_v44 = vsel %vm821_vm1, %v2282_v39, -inf }
 0x985   : > { %v2315_v9 = vsel %vm821_vm1, %v2293_v21, -inf  ;;  %p3565_p9 = pnand %p3564_p13, %p4602_p6 }
 0x986   : > { %v2313_v14 = vsel %vm821_vm1, %v2285_v49, -inf }
 0x987   : > { %p3566_p0 = pneg %p3565_p9 }
 0x988   : > { %v3139_v28 = vpop.f32.mrb[28].mxu1 }
 0x989   : > { %v2306_v13 = vadd.f32 %v3139_v28, %v2918_v27  ;;  %v2297_v40 = vpop.f32.mrb[29].mxu1 }
 0x98a   : > { %v2298_v41 = vadd.f32 %v2918_v27, %v2297_v40  ;;  %v3140_v42 = vpop.f32.mrb[30].mxu1 }
 0x98b   : > { %v2320_v43 = vsel %vm821_vm1, %v2306_v13, -inf  ;;  %v2309_v16 = vadd.f32 %v3140_v42, %v2918_v27  ;;  %v2300_v22 = vpop.f32.mrb[31].mxu1  ;;  %v2575_v13 = vld [vmem:[%s4600_s16] sm:$0x1]  ;;  %s3569_s16 = scalar_lea.vmem %s3568_s22, 32 }
 0x98c   : > { %v2321_v35 = vmax.f32 %v2314_v7, %v2320_v43  ;;  %v2316_v32 = vsel %vm821_vm1, %v2298_v41, -inf  ;;  %v2301_v45 = vadd.f32 %v2918_v27, %v2300_v22  ;;  %p3571_p7 = scmp.lt.s32.totalorder %s3569_s16, %s3563_s25 }
 0x98d   : > { %v2317_v46 = vmax.f32 %v2312_v44, %v2316_v32  ;;  %v2322_v19 = vsel %vm821_vm1, %v2309_v16, -inf }
 0x98e   : > { %v2323_v38 = vmax.f32 %v2315_v9, %v2322_v19  ;;  %v2318_v0 = vsel %vm821_vm1, %v2301_v45, -inf  ;;  %p3572_p8 = por %p3571_p7, %p3570_p5 }
 0x98f   : > { %v2319_v48 = vmax.f32 %v2313_v14, %v2318_v0 }
 0x990   : > { %v2325_v50 = vmax.f32 %v2321_v35, %v2323_v38  ;;  %p3573_p4 = pnand %p3572_p8, %p3566_p0 }
 0x991   : > { %v2324_v51 = vmax.f32 %v2317_v46, %v2319_v48 }
 0x993   : > { %v2326_v52 = vmax.f32 %v2324_v51, %v2325_v50 }
 0x995   : > { %v2327_v53 = vpack.c.bf16 %v2326_v52, %v2326_v52 }
 0x997   : > { %3150 = vmatmul.mubr.msk.bf16.vlgmr.msra.gmra.mrb[32].mxu0 %vm821_vm1, %v2327_v53 }
 0x998   : > { %3169 = vmatprep.mubr.msk.bf16.mxu0 %vm3664_vm2, %v3663_v3  ;;  %3166 = vmatpush3.bf16.msra.mxu0 %v3359_v20 }
 0x999   : > { %3167 = vmatprep.subr.bf16.mxu0 %v3663_v3 }
 0x99c   : > { %3168 = vmatpush3.bf16.msra.mxu0 %v3360_v29 }
 0xa6a   : > { %v2406_v58 = vpop.f32.mrb[32].mxu0 }
 0xa6b   : > { %v2407_v61 = vadd.f32 %v2928_v54, %v2406_v58  ;;  %v3151_v62 = vpop.f32.mrb[33].mxu0 }
 0xa6c   : > { %v2409_v63 = vpop.f32.mrb[34].mxu0 }
 0xa6d   : > { %v2412_v1 = vadd.f32 %v2407_v61, %v1745_v60  ;;  %v3152_v2 = vpop.f32.mrb[35].mxu0 }
 0xa6f   : > { %v2413_v4 = vmax.f32 %v2412_v1, 0.0 }
 0xa71   : > { %v2414_v5 = vpack.c.bf16 %v2413_v4, %v2413_v4 }
 0xa73   : > { %3162 = vmatmul.mubr.msk.bf16.vlgmr.msra.gmra.mrb[32].mxu1 %vm821_vm1, %v2414_v5 }
 0xa74   : > { %3177 = vmatprep.mubr.msk.bf16.mxu1 %vm3664_vm2, %v3663_v3  ;;  %3174 = vmatpush3.bf16.msra.mxu1 %v3361_v47 }
 0xa75   : > { %3175 = vmatprep.subr.bf16.mxu1 %v3663_v3 }
 0xa78   : > { %3176 = vmatpush3.bf16.msra.mxu1 %v3362_v33 }
 0xb46   : > { %v2493_v6 = vpop.f32.mrb[32].mxu1 }
 0xb47   : > { %v2494_v11 = vadd.f32 %v2943_v59, %v2493_v6  ;;  %v3163_v12 = vpop.f32.mrb[33].mxu1 }
 0xb48   : > { %v2496_v15 = vpop.f32.mrb[34].mxu1 }
 0xb49   : > { %v2499_v17 = vsel %vm758_vm0, %v2494_v11, 0.0  ;;  %v3164_v18 = vpop.f32.mrb[35].mxu1 }
 0xb4a   : > { %v2500_v23 = vrot.slane %v2499_v17, 4 }
 0xb4c   : > { %v2501_v24 = vadd.f32 %v2500_v23, %v2499_v17 }
 0xb4e   : > { %v2502_v8 = vrot.slane %v2501_v24, 2 }
 0xb50   : > { %v2503_v30 = vadd.f32 %v2502_v8, %v2501_v24 }
 0xb52   : > { %v2504_v31 = vrot.slane %v2503_v30, 1 }
 0xb54   : > { %v2505_v10 = vadd.f32 %v2504_v31, %v2503_v30 }
 0xb56   : > { %v2507_v3 = vmul.f32 0.125, %v2505_v10 }
 0xb58   : > { %v2508_v25 = vpack.c.bf16 %v2507_v3, %v2507_v3 }
 0xb5a   : > { %3170 = vmatmul.mubr.msk.bf16.vlgmr.msra.gmra.mrb[36].mxu0 %vm758_vm0, %v2508_v25 }
 0xc2d   : > { %v2563_v26 = vpop.f32.mrb[36].mxu0 }
 0xc2e   : > { %v2564_v36 = vadd.f32 %v2563_v26, %v2513_v34  ;;  %v3171_v27 = vpop.f32.mrb[37].mxu0 }
 0xc2f   : > { %v2566_v37 = vpop.f32.mrb[38].mxu0 }
 0xc30   : > { %v2569_v39 = vmax.f32 %v2564_v36, 0.0  ;;  %v3172_v28 = vpop.f32.mrb[39].mxu0 }
 0xc32   : > { %v2570_v21 = vpack.c.bf16 %v2569_v39, %v2569_v39 }
 0xc34   : > { %3178 = vmatmul.mubr.msk.bf16.vlgmr.msra.gmra.mrb[36].mxu1 %vm758_vm0, %v2570_v21 }
 0xd07   : > { %v2625_v40 = vpop.f32.mrb[36].mxu1 }
 0xd08   : > { %v2626_v49 = vadd.f32 %v2625_v40, %v2575_v13  ;;  %v3179_v41 = vpop.f32.mrb[37].mxu1 }
 0xd09   : > { %v2628_v42 = vpop.f32.mrb[38].mxu1 }
 0xd0a   : > { %v3180_v7 = vpop.f32.mrb[39].mxu1  ;;  %2632 = vst.msk [vmem:[%s742_s15] sm:$0x1] %vm2631_vm3, %v2626_v49 }
 0xd0b   : > { %3576 = shalt.err (!%p3573_p4)
}
 0xd0c   : > { %s3577_s14 = scalar_lea.hbm %s4468_s26, 16  ;;  %s3581_s29 = scalar_lea.hbm %s4601_s9, 32 }
 0xd0d   : > { %p3578_p3 = scmp.ne.s32.totalorder %s4468_s26, %s3577_s14  ;;  %p3582_p11 = scmp.lt.u32.totalorder %s4468_s26, %s4601_s9 }
 0xd0e   : > { %p3583_p12 = scmp.lt.u32.totalorder %s3581_s29, %s3577_s14  ;;  %p3585_p13 = scmp.lt.u32.totalorder %s3577_s14, %s4468_s26 }
 0xd0f   : > { %p3579_p10 = pnand %p3578_p3, %p4602_p6 }
 0xd10   : > { %p3584_p2 = por %p3583_p12, %p3582_p11 }
 0xd11   : > { %p3580_p1 = pneg %p3579_p10 }
 0xd12   : > { %p3586_p9 = por %p3585_p13, %p3584_p2 }
 0xd14   : > { %p3587_p0 = pnand %p3586_p9, %p3580_p1 }
 0xd16   : > { %3590 = shalt.err (!%p3587_p0)
}
 0xd17   : > { %3205 = dma.vmem_to_hbm [thread:$0]  (%p4602_p6), %s4470_s4, 16, %s4468_s26, %s2634_s2  }
 0xd18 PF: > { %s2658_s25 = sand.u32 1, %s3633_s0   ;;  %p4603_p5 = scmp.ne.s32.totalorder %s4578_s27, 0 }
 0xd19   : > { %p4604_p7 = scmp.ge.s32.totalorder %s3645_s21, 2  ;;  %s2659_s22 = scalar_lea.sflag [#allocation4], %s2658_s25 }
 0xd1b   : > { %p3231_p8 = pnand %p4604_p7, %p4603_p5 }
 0xd1d   : > { %3628 = dma.done.wait (!%p3231_p8), %s2659_s22, 16  }
 0xd1e   : > { %3630 = vsyncadd (!%p3231_p8), %s2659_s22, 4294967280  ;;  %p37_p4 = scmp.ge.s32.totalorder %s3935_s24, 4   ;;  %s4605_s0 = smov %s3637_s30 }
 0xd1f   : > { %s4606_s30 = smov %s3641_s20  ;;  %s4607_s20 = smov %s3947_s18 }
 0xd20   : > { %s4608_s21 = smov %s3935_s24  ;;  %39 = sbr.rel (!%p37_p4) target bundleno = 26 (0x1a), region = 190 }
 0xd27   :  { %2663 = vsyncpa [#allocation3], 1 }
 0xd28   :  { %2665 = vsyncpa [#allocation3 + $0x1], 1 }
 0xd29   :  { %2666 = vsyncpa [#allocation6], 1 }
 0xd2a   :  { %2668 = vsyncpa [#allocation6 + $0x1], 1 }
 0xd2b   :  { %2669 = vsyncpa [#allocation9], 1 }
 0xd2c   :  { %2670 = vsyncpa [#allocation12], 1 }
 0xd2d   :  { %2671 = vsyncpa [#allocation4], 1 }
 0xd2e   :  { %2673 = vsyncpa [#allocation4 + $0x1], 1 }

</bundles_post_ra>
